<compile_context>
chip_gen: v6e
topology: v6e:2x2x1
jax: 0.10.0
libtpu: 0.0.40
codegen_flags: <defaults>
</compile_context>

<pallas_src>
import math

import jax
import jax.numpy as jnp
from jax.experimental import pallas as pl
from jax.experimental.pallas import tpu as pltpu

N_HEADS = 4
LN_EPS = 1e-5  # torch.nn.LayerNorm default


def co_attention_kernel(node1_ref, node2_ref, wq_ref, wkv_ref, bias_ref,
                        ln_ref, mask_ref, out_ref):
    bb, seq, h = node1_ref.shape
    rows = bb * seq

    x1 = node1_ref[...].reshape(rows, h)
    x2 = node2_ref[...].reshape(rows, h)
    b = bias_ref[...]                                    # (1, 3h): [bq*s | bk | bv]

    # Fused projections (2 MXU matmuls).  1/sqrt(d) is pre-folded into Wq / bq,
    # and the K/V biases are added once here instead of per head.
    q = jnp.dot(x1, wq_ref[...], preferred_element_type=jnp.float32) + b[:, :h]
    kv = jnp.dot(x2, wkv_ref[...], preferred_element_type=jnp.float32) + b[:, h:]

    q3 = q.reshape(bb, seq, h)
    k3 = kv[:, :h].reshape(bb, seq, h)
    v3 = kv[:, h:].reshape(bb, seq, h)

    # Block-diagonal K:  kbd[b, c, p] = k3[b, c % seq, p] * (head(c) == head(p)).
    # Contracting the last dims of q3 and kbd yields every head's (q_h @ k_h^T)
    # already laid out along the h axis next to v3, so one batched
    # (seq, h) x (h, h) matmul per instance replaces 4 tiny per-head matmuls,
    # and all downstream work is 32-lane dense.
    kbd = jnp.concatenate([k3] * N_HEADS, axis=1) * mask_ref[...]    # (bb, h, h)
    dn = (((2,), (2,)), ((0,), (0,)))
    attn = jax.lax.dot_general(q3, kbd, dn,
                               preferred_element_type=jnp.float32)   # (bb, seq, h)
    r = attn * v3

    # LayerNorm over the full h axis: single dense pass + single dense store.
    mean = jnp.mean(r, axis=-1, keepdims=True)
    cen = r - mean
    var = jnp.mean(cen * cen, axis=-1, keepdims=True)
    inv = jax.lax.rsqrt(var + LN_EPS)
    out_ref[...] = cen * inv * ln_ref[0:1, :] + ln_ref[1:2, :]


def co_attention_head(node1, node2, params, *, block_b=None):
    """node1, node2: (B, seq, h_dim) f32.  Returns (B, seq, h_dim) f32."""
    B, seq, h = node1.shape
    if h % N_HEADS != 0:
        raise ValueError("h_dim must be divisible by 4")
    d = h // N_HEADS
    if seq != d:
        raise ValueError(
            f"Co_attention_head requires seq == h_dim//4 (torch broadcast); "
            f"got seq={seq}, h_dim//4={d}")

    if block_b is None:
        # Cover the batch in <=2 grid steps (amortizes per-step overhead; each
        # v7x TensorCore takes one parallel step).  Keep block_b a multiple of
        # 16 when large enough so block_b*seq is a multiple of 128 for the MXU.
        block_b = max(1, (B + 1) // 2)
        if block_b >= 16:
            block_b = ((block_b + 15) // 16) * 16
    block_b = max(1, block_b)

    n_steps = -(-B // block_b)
    B_pad = n_steps * block_b
    if B_pad != B:
        pad = B_pad - B
        node1 = jnp.pad(node1, ((0, pad), (0, 0), (0, 0)))
        node2 = jnp.pad(node2, ((0, pad), (0, 0), (0, 0)))

    # Constant block-diagonal head mask (h, h): 1 where row & col are in the
    # same head block.  Passed as an input so it stays VMEM-resident.
    hid = jnp.arange(h, dtype=jnp.int32) // d
    mask = (hid[:, None] == hid[None, :]).astype(jnp.float32)

    const2 = lambda i: (0, 0)
    blk3 = lambda i: (i, 0, 0)

    out = pl.pallas_call(
        co_attention_kernel,
        out_shape=jax.ShapeDtypeStruct((B_pad, seq, h), jnp.float32),
        grid=(n_steps,),
        in_specs=[
            pl.BlockSpec((block_b, seq, h), blk3),   # node1
            pl.BlockSpec((block_b, seq, h), blk3),   # node2
            pl.BlockSpec((h, h), const2),            # Wq (1/sqrt(d) folded in)
            pl.BlockSpec((h, 2 * h), const2),        # [Wk | Wv]
            pl.BlockSpec((1, 3 * h), const2),        # [bq*scale | bk | bv]
            pl.BlockSpec((2, h), const2),            # [gamma; beta]
            pl.BlockSpec((h, h), const2),            # block-diagonal head mask
        ],
        out_specs=pl.BlockSpec((block_b, seq, h), blk3),
        compiler_params=pltpu.CompilerParams(dimension_semantics=("parallel",)),
    )(node1, node2, params["wq"], params["wkv"], params["bias"], params["ln"], mask)

    return out[:B] if B_pad != B else out


def init_params(key, h_dim):
    """Deterministic init matching PyTorch Linear defaults, packed for the kernel.

    The 1/sqrt(h_dim//4) attention scale is folded into Wq and bq (equivalent
    to torch's explicit division of q @ k.T).
    """
    d = h_dim // N_HEADS
    scale = 1.0 / math.sqrt(d)
    bound = 1.0 / math.sqrt(h_dim)
    keys = jax.random.split(key, 24)

    def pack_w(wkeys):
        # torch weight is (d, h_dim) and y = x W^T + b, so the packed kernel
        # weight is (h_dim, h_dim_out) with the 4 heads as column blocks.
        ws = [jax.random.uniform(k, (h_dim, d), jnp.float32, -bound, bound)
              for k in wkeys]
        return jnp.concatenate(ws, axis=1)

    def pack_b(bkeys):
        bs = [jax.random.uniform(k, (d,), jnp.float32, -bound, bound)
              for k in bkeys]
        return jnp.concatenate(bs, axis=0)

    wq = pack_w(keys[0:4]) * scale
    bq = pack_b(keys[4:8]) * scale
    wk = pack_w(keys[8:12]);  bk = pack_b(keys[12:16])
    wv = pack_w(keys[16:20]); bv = pack_b(keys[20:24])

    wkv = jnp.concatenate([wk, wv], axis=1)                       # (h, 2h)
    bias = jnp.concatenate([bq, bk, bv], axis=0)[None, :]         # (1, 3h)
    ln = jnp.stack([jnp.ones((h_dim,), jnp.float32),              # gamma
                    jnp.zeros((h_dim,), jnp.float32)], axis=0)    # beta
    return {"wq": wq, "wkv": wkv, "bias": bias, "ln": ln}


def reference(node1, node2, params):
    """Pure-JAX reference mirroring the PyTorch forward (batched)."""
    h = node1.shape[-1]
    d = h // N_HEADS
    bias = params["bias"][0]
    bq, bk, bv = bias[:h], bias[h:2 * h], bias[2 * h:]
    gamma, beta = params["ln"][0], params["ln"][1]
    q = node1 @ params["wq"] + bq          # 1/sqrt(d) already folded into wq/bq
    kv = node2 @ params["wkv"]
    k = kv[..., :h] + bk
    v = kv[..., h:] + bv
    rs = []
    for hd in range(N_HEADS):
        sl = slice(hd * d, (hd + 1) * d)
        attn = jnp.einsum("bqd,bkd->bqk", q[..., sl], k[..., sl])
        rs.append(attn * v[..., sl])
    r = jnp.concatenate(rs, axis=-1)
    mean = r.mean(-1, keepdims=True)
    var = ((r - mean) ** 2).mean(-1, keepdims=True)
    return (r - mean) / jnp.sqrt(var + LN_EPS) * gamma + beta


if __name__ == "__main__":
    h_dim = 32
    seq = h_dim // N_HEADS  # 8 -- required by the torch broadcast (N,M)*(M,d)
    B = 64                  # batch of co-attention problem instances

    key = jax.random.PRNGKey(0)
    k_n1, k_n2, k_p = jax.random.split(key, 3)
    node1 = jax.random.normal(k_n1, (B, seq, h_dim), jnp.float32)
    node2 = jax.random.normal(k_n2, (B, seq, h_dim), jnp.float32)
    params = init_params(k_p, h_dim)

    out = jax.block_until_ready(co_attention_head(node1, node2, params))
    ref = reference(node1, node2, params)
    assert out.shape == (B, seq, h_dim)
    max_err = float(jnp.max(jnp.abs(out - ref)))
    assert jnp.allclose(out, ref, atol=3e-4, rtol=3e-4), \
        f"mismatch vs reference (max err {max_err})"
    print("KERNEL_OK")
</pallas_src>

<mosaic_0001>
module attributes {stable_mosaic.version = 11 : i64} {
  func.func @co_attention_kernel(%arg0: i32, %arg1: memref<32x8x32xf32, #tpu.memory_space<vmem>>, %arg2: memref<32x8x32xf32, #tpu.memory_space<vmem>>, %arg3: memref<32x32xf32, #tpu.memory_space<vmem>>, %arg4: memref<32x64xf32, #tpu.memory_space<vmem>>, %arg5: memref<1x96xf32, #tpu.memory_space<vmem>>, %arg6: memref<2x32xf32, #tpu.memory_space<vmem>>, %arg7: memref<32x32xf32, #tpu.memory_space<vmem>>, %arg8: memref<32x8x32xf32, #tpu.memory_space<vmem>>) attributes {dimension_semantics = [#tpu.dimension_semantics<parallel>], iteration_bounds = array<i64: 2>, scalar_prefetch = 0 : i64, scratch_operands = 0 : i64, tpu.core_type = #tpu.core_type<tc>, window_params = [{transform_indices = @transform_0, window_bounds = array<i64: 32, 8, 32>}, {transform_indices = @transform_1, window_bounds = array<i64: 32, 8, 32>}, {pipeline_mode = #tpu.pipeline_mode<synchronous>, transform_indices = @transform_2, window_bounds = array<i64: 32, 32>}, {pipeline_mode = #tpu.pipeline_mode<synchronous>, transform_indices = @transform_3, window_bounds = array<i64: 32, 64>}, {pipeline_mode = #tpu.pipeline_mode<synchronous>, transform_indices = @transform_4, window_bounds = array<i64: 1, 96>}, {pipeline_mode = #tpu.pipeline_mode<synchronous>, transform_indices = @transform_5, window_bounds = array<i64: 2, 32>}, {pipeline_mode = #tpu.pipeline_mode<synchronous>, transform_indices = @transform_6, window_bounds = array<i64: 32, 32>}, {transform_indices = @transform_7, window_bounds = array<i64: 32, 8, 32>}]} {
    %c0 = arith.constant 0 : index
    %c0_0 = arith.constant 0 : index
    %c0_1 = arith.constant 0 : index
    %0 = vector.load %arg1[%c0, %c0_0, %c0_1] : memref<32x8x32xf32, #tpu.memory_space<vmem>>, vector<32x8x32xf32>
    %1 = vector.shape_cast %0 : vector<32x8x32xf32> to vector<256x32xf32>
    %c0_2 = arith.constant 0 : index
    %c0_3 = arith.constant 0 : index
    %c0_4 = arith.constant 0 : index
    %2 = vector.load %arg2[%c0_2, %c0_3, %c0_4] : memref<32x8x32xf32, #tpu.memory_space<vmem>>, vector<32x8x32xf32>
    %3 = vector.shape_cast %2 : vector<32x8x32xf32> to vector<256x32xf32>
    %c0_5 = arith.constant 0 : index
    %c0_6 = arith.constant 0 : index
    %4 = vector.load %arg5[%c0_5, %c0_6] : memref<1x96xf32, #tpu.memory_space<vmem>>, vector<1x96xf32>
    %c0_7 = arith.constant 0 : index
    %c0_8 = arith.constant 0 : index
    %5 = vector.load %arg3[%c0_7, %c0_8] : memref<32x32xf32, #tpu.memory_space<vmem>>, vector<32x32xf32>
    %cst = arith.constant dense<0.000000e+00> : vector<256x32xf32>
    %6 = tpu.matmul %1, %5, %cst {dimension_numbers = #tpu.dot_dimension_numbers<[1], [0], [0], [1], [0, 0, 1, 1], [], []>} : vector<256x32xf32>, vector<32x32xf32>, vector<256x32xf32> -> vector<256x32xf32>
    %7 = vector.extract_strided_slice %4 {offsets = [0, 0], sizes = [1, 32], strides = [1, 1]} : vector<1x96xf32> to vector<1x32xf32>
    %8 = vector.broadcast %7 : vector<1x32xf32> to vector<256x32xf32>
    %9 = arith.addf %6, %8 : vector<256x32xf32>
    %c0_9 = arith.constant 0 : index
    %c0_10 = arith.constant 0 : index
    %10 = vector.load %arg4[%c0_9, %c0_10] : memref<32x64xf32, #tpu.memory_space<vmem>>, vector<32x64xf32>
    %cst_11 = arith.constant dense<0.000000e+00> : vector<256x64xf32>
    %11 = tpu.matmul %3, %10, %cst_11 {dimension_numbers = #tpu.dot_dimension_numbers<[1], [0], [0], [1], [0, 0, 1, 1], [], []>} : vector<256x32xf32>, vector<32x64xf32>, vector<256x64xf32> -> vector<256x64xf32>
    %12 = vector.extract_strided_slice %4 {offsets = [0, 32], sizes = [1, 64], strides = [1, 1]} : vector<1x96xf32> to vector<1x64xf32>
    %13 = vector.broadcast %12 : vector<1x64xf32> to vector<256x64xf32>
    %14 = arith.addf %11, %13 : vector<256x64xf32>
    %15 = vector.shape_cast %9 : vector<256x32xf32> to vector<32x8x32xf32>
    %16 = vector.extract_strided_slice %14 {offsets = [0, 0], sizes = [256, 32], strides = [1, 1]} : vector<256x64xf32> to vector<256x32xf32>
    %17 = vector.shape_cast %16 : vector<256x32xf32> to vector<32x8x32xf32>
    %18 = vector.extract_strided_slice %14 {offsets = [0, 32], sizes = [256, 32], strides = [1, 1]} : vector<256x64xf32> to vector<256x32xf32>
    %19 = vector.shape_cast %18 : vector<256x32xf32> to vector<32x8x32xf32>
    %20 = tpu.concatenate %17, %17, %17, %17 in 1 : vector<32x8x32xf32>, vector<32x8x32xf32>, vector<32x8x32xf32>, vector<32x8x32xf32> -> vector<32x32x32xf32>
    %c0_12 = arith.constant 0 : index
    %c0_13 = arith.constant 0 : index
    %21 = vector.load %arg7[%c0_12, %c0_13] : memref<32x32xf32, #tpu.memory_space<vmem>>, vector<32x32xf32>
    %22 = vector.shape_cast %21 : vector<32x32xf32> to vector<1x32x32xf32>
    %23 = vector.broadcast %22 : vector<1x32x32xf32> to vector<32x32x32xf32>
    %24 = arith.mulf %20, %23 : vector<32x32x32xf32>
    %cst_14 = arith.constant dense<0.000000e+00> : vector<32x8x32xf32>
    %25 = tpu.matmul %15, %24, %cst_14 {dimension_numbers = #tpu.dot_dimension_numbers<[2], [2], [1], [1], [0, 0, 0, 1, 1, 1], [0], [0]>} : vector<32x8x32xf32>, vector<32x32x32xf32>, vector<32x8x32xf32> -> vector<32x8x32xf32>
    %26 = arith.mulf %25, %19 : vector<32x8x32xf32>
    %cst_15 = arith.constant dense<0.000000e+00> : vector<32x8xf32>
    %27 = vector.multi_reduction <add>, %26, %cst_15 [2] : vector<32x8x32xf32> to vector<32x8xf32>
    %28 = vector.shape_cast %27 : vector<32x8xf32> to vector<32x8x1xf32>
    %cst_16 = arith.constant 3.200000e+01 : f32
    %29 = vector.broadcast %cst_16 : f32 to vector<32x8x1xf32>
    %30 = arith.divf %28, %29 : vector<32x8x1xf32>
    %31 = vector.broadcast %30 : vector<32x8x1xf32> to vector<32x8x32xf32>
    %32 = arith.subf %26, %31 : vector<32x8x32xf32>
    %33 = arith.mulf %32, %32 : vector<32x8x32xf32>
    %cst_17 = arith.constant dense<0.000000e+00> : vector<32x8xf32>
    %34 = vector.multi_reduction <add>, %33, %cst_17 [2] : vector<32x8x32xf32> to vector<32x8xf32>
    %35 = vector.shape_cast %34 : vector<32x8xf32> to vector<32x8x1xf32>
    %cst_18 = arith.constant 3.200000e+01 : f32
    %36 = vector.broadcast %cst_18 : f32 to vector<32x8x1xf32>
    %37 = arith.divf %35, %36 : vector<32x8x1xf32>
    %cst_19 = arith.constant 9.99999974E-6 : f32
    %38 = vector.broadcast %cst_19 : f32 to vector<32x8x1xf32>
    %39 = arith.addf %37, %38 : vector<32x8x1xf32>
    %40 = math.rsqrt %39 : vector<32x8x1xf32>
    %41 = vector.broadcast %40 : vector<32x8x1xf32> to vector<32x8x32xf32>
    %42 = arith.mulf %32, %41 : vector<32x8x32xf32>
    %c0_20 = arith.constant 0 : index
    %c0_21 = arith.constant 0 : index
    %43 = vector.load %arg6[%c0_20, %c0_21] : memref<2x32xf32, #tpu.memory_space<vmem>>, vector<1x32xf32>
    %44 = vector.shape_cast %43 : vector<1x32xf32> to vector<1x1x32xf32>
    %45 = vector.broadcast %44 : vector<1x1x32xf32> to vector<32x8x32xf32>
    %46 = arith.mulf %42, %45 : vector<32x8x32xf32>
    %c1 = arith.constant 1 : index
    %c0_22 = arith.constant 0 : index
    %47 = vector.load %arg6[%c1, %c0_22] : memref<2x32xf32, #tpu.memory_space<vmem>>, vector<1x32xf32>
    %48 = vector.shape_cast %47 : vector<1x32xf32> to vector<1x1x32xf32>
    %49 = vector.broadcast %48 : vector<1x1x32xf32> to vector<32x8x32xf32>
    %50 = arith.addf %46, %49 : vector<32x8x32xf32>
    %c0_23 = arith.constant 0 : index
    %c0_24 = arith.constant 0 : index
    %c0_25 = arith.constant 0 : index
    %51 = vector.load %arg8[%c0_23, %c0_24, %c0_25] : memref<32x8x32xf32, #tpu.memory_space<vmem>>, vector<32x8x32xf32>
    tpu.vector_store %arg8[%c0_23, %c0_24, %c0_25], %50 {strides = array<i32>} : memref<32x8x32xf32, #tpu.memory_space<vmem>>, vector<32x8x32xf32>,
    return
  }
  func.func @transform_0(%arg0: i32) -> (i32, i32, i32) {
    %c0_i32 = arith.constant 0 : i32
    %c0_i32_0 = arith.constant 0 : i32
    %c0_i32_1 = arith.constant 0 : i32
    return %arg0, %c0_i32, %c0_i32_0 : i32, i32, i32
  }
  func.func @transform_1(%arg0: i32) -> (i32, i32, i32) {
    %c0_i32 = arith.constant 0 : i32
    %c0_i32_0 = arith.constant 0 : i32
    %c0_i32_1 = arith.constant 0 : i32
    return %arg0, %c0_i32, %c0_i32_0 : i32, i32, i32
  }
  func.func @transform_2(%arg0: i32) -> (i32, i32) {
    %c0_i32 = arith.constant 0 : i32
    %c0_i32_0 = arith.constant 0 : i32
    %c0_i32_1 = arith.constant 0 : i32
    return %c0_i32, %c0_i32_0 : i32, i32
  }
  func.func @transform_3(%arg0: i32) -> (i32, i32) {
    %c0_i32 = arith.constant 0 : i32
    %c0_i32_0 = arith.constant 0 : i32
    %c0_i32_1 = arith.constant 0 : i32
    return %c0_i32, %c0_i32_0 : i32, i32
  }
  func.func @transform_4(%arg0: i32) -> (i32, i32) {
    %c0_i32 = arith.constant 0 : i32
    %c0_i32_0 = arith.constant 0 : i32
    %c0_i32_1 = arith.constant 0 : i32
    return %c0_i32, %c0_i32_0 : i32, i32
  }
  func.func @transform_5(%arg0: i32) -> (i32, i32) {
    %c0_i32 = arith.constant 0 : i32
    %c0_i32_0 = arith.constant 0 : i32
    %c0_i32_1 = arith.constant 0 : i32
    return %c0_i32, %c0_i32_0 : i32, i32
  }
  func.func @transform_6(%arg0: i32) -> (i32, i32) {
    %c0_i32 = arith.constant 0 : i32
    %c0_i32_0 = arith.constant 0 : i32
    %c0_i32_1 = arith.constant 0 : i32
    return %c0_i32, %c0_i32_0 : i32, i32
  }
  func.func @transform_7(%arg0: i32) -> (i32, i32, i32) {
    %c0_i32 = arith.constant 0 : i32
    %c0_i32_0 = arith.constant 0 : i32
    %c0_i32_1 = arith.constant 0 : i32
    return %arg0, %c0_i32, %c0_i32_0 : i32, i32, i32
  }
}

</mosaic_0001>

<bundles_post_ra>
// kernel: tpu_custom_call.1
= control target key start
LH: loop header
LB: loop body
LE: loop exit
PB: predicated region body
PF: predicated region fallthrough
CT: control target
= control target key end

     0   :  { %s5695_s24 = smov 0   ;;  %s7318_s0 = inlined_call_operand.vmem [shape: f32[64,8,32], index: 0, kind: input, shape index: {}]   ;;  %s7319_s1 = inlined_call_operand.vmem [shape: f32[64,8,32], index: 1, kind: input, shape index: {}]   ;;  %s7320_s2 = inlined_call_operand.vmem [shape: f32[32,32], index: 2, kind: input, shape index: {}]   ;;  %s7321_s3 = inlined_call_operand.vmem [shape: f32[32,64], index: 3, kind: input, shape index: {}]   ;;  %s7322_s4 = inlined_call_operand.vmem [shape: f32[1,96], index: 4, kind: input, shape index: {}]   ;;  %s7323_s5 = inlined_call_operand.vmem [shape: f32[2,32], index: 5, kind: input, shape index: {}]   ;;  %s7324_s6 = inlined_call_operand.vmem [shape: f32[32,32], index: 6, kind: input, shape index: {}]   ;;  %s7325_s7 = inlined_call_operand.vmem [shape: f32[64,8,32], index: 7, kind: output, shape index: {}]  }
   0x1 LB: > { %s4632_s25 = sadd.s32 4294967295, %s5650_s24   ;;  %p4636_p0 = scmp.ge.s32.totalorder %s5650_s24, 1  ;;  %s5650_s24 = sphi %s5695_s24, %s17_s24  }
   0x2   : > { %p249_p1 = scmp.lt.s32.totalorder %s5650_s24, 3 }
   0x4   : > { %p250_p2 = pnand %p4636_p0, %p249_p1 }
   0x6   : > { %253 = sbr.rel (%p250_p2) target bundleno = 982 (0x3d6), region = 48 }
   0xb   : > { %v704_v0 = vld [vmem:[%s7321_s3 + $0x18] sm:$0xff]  ;;  %v703_v1 = vld [vmem:[%s7321_s3 + $0x10] sm:$0xff]  ;;  %s4637_s30 = sshll.u32 %s4632_s25, 5  ;;  %v702_v4 = vld [vmem:[%s7321_s3 + $0x8] sm:$0xff]  ;;  %vm379_vm0 = vcmask 261120   ;;  %vm5654_vm1 = vmmov 0  }
   0xc   : > { %5160 = vmatprep.subr.mxu1 %v704_v0  ;;  %p287_p3 = scmp.lt.s32.totalorder %s4637_s30, 63  ;;  %v372_v2 = vld [vmem:[%s7320_s2 + $0x18] sm:$0xff]  ;;  %v371_v3 = vld [vmem:[%s7320_s2 + $0x10] sm:$0xff]  ;;  %v370_v5 = vld [vmem:[%s7320_s2 + $0x8] sm:$0xff] }
   0xd   : > { %5161 = vmatpush3.msra.mxu1 %v704_v0  ;;  %5104 = vmatprep.subr.mxu0 %v372_v2  ;;  %v701_v6 = vld [vmem:[%s7321_s3] sm:$0xff] }
   0xe   : > { %5162 = vmatprep.subr.mxu1 %v703_v1  ;;  %s7406_s30 = smov (!%p287_p3, %s4637_s30), 63  ;;  %5105 = vmatpush3.msra.mxu0 %v372_v2  ;;  %v369_v7 = vld [vmem:[%s7320_s2] sm:$0xff]  ;;  %v7326_v2 = vmov 0.0  }
   0xf   : > { %5163 = vmatpush3.msra.mxu1 %v703_v1  ;;  %5106 = vmatprep.subr.mxu0 %v371_v3  ;;  %s5724_s18 = sshll.u32 %s7406_s30, 3  ;;  %v5748_v11 = vld [vmem:[%s7322_s4] ss:$0 sm:$0xff]  ;;  %s5652_s30 = smov 96  }
  0x10   : > { %5164 = vmatprep.subr.mxu1 %v702_v4  ;;  %5107 = vmatpush3.msra.mxu0 %v371_v3  ;;  %s5730_s21 = scalar_lea.vmem %s7319_s1, %s5724_s18  ;;  %s5742_s27 = scalar_lea.vmem %s7318_s0, %s5724_s18 }
  0x11   : > { %5165 = vmatpush3.msra.mxu1 %v702_v4  ;;  %5108 = vmatprep.subr.mxu0 %v370_v5  ;;  %v336_v8 = vld [vmem:[%s5730_s21] sm:$0xff]  ;;  %v337_v9 = vld [vmem:[%s5730_s21 + $0x8] sm:$0xff]  ;;  %v338_v10 = vld [vmem:[%s5730_s21 + $0x10] sm:$0xff]  ;;  %s7156_s26 = scalar_lea.vmem %s7325_s7, %s5724_s18 }
  0x12   : > { %5166 = vmatprep.subr.mxu1 %v701_v6  ;;  %5109 = vmatpush3.msra.mxu0 %v370_v5  ;;  %v339_v12 = vld [vmem:[%s5730_s21 + $0x18] sm:$0xff]  ;;  %v304_v13 = vld [vmem:[%s5742_s27] sm:$0xff]  ;;  %v305_v14 = vld [vmem:[%s5742_s27 + $0x8] sm:$0xff] }
  0x13   : > { %5167 = vmatpush3.msra.mxu1 %v701_v6  ;;  %5168 = vmatprep.mubr.msk.f32.mxu1 %vm379_vm0, %v336_v8  ;;  %v340_v15 = vld [vmem:[%s5730_s21 + $0x20] sm:$0xff]  ;;  %v306_v16 = vld [vmem:[%s5742_s27 + $0x10] sm:$0xff]  ;;  %v341_v17 = vld [vmem:[%s5730_s21 + $0x28] sm:$0xff] }
  0x14   : > { %5169 = vmatmul.mubr.msk.f32.vlgmr.msra.gmra.mxu1 %vm379_vm0, %v337_v9  ;;  %5110 = vmatprep.subr.mxu0 %v369_v7  ;;  %v307_v18 = vld [vmem:[%s5742_s27 + $0x18] sm:$0xff]  ;;  %v342_v19 = vld [vmem:[%s5730_s21 + $0x30] sm:$0xff]  ;;  %v308_v20 = vld [vmem:[%s5742_s27 + $0x20] sm:$0xff] }
  0x15   : > { %5171 = vmatprep.mubr.msk.f32.mxu1 %vm379_vm0, %v338_v10  ;;  %5111 = vmatpush3.msra.mxu0 %v369_v7  ;;  %v309_v21 = vld [vmem:[%s5742_s27 + $0x28] sm:$0xff]  ;;  %v343_v22 = vld [vmem:[%s5730_s21 + $0x38] sm:$0xff]  ;;  %v344_v23 = vld [vmem:[%s5730_s21 + $0x40] sm:$0xff] }
  0x16   : > { %5112 = vmatprep.mubr.msk.f32.mxu0 %vm379_vm0, %v304_v13  ;;  %705 = vrot.lane.b32.xlu0 %v5748_v11, %s5652_s30  ;;  %v310_v24 = vld [vmem:[%s5742_s27 + $0x30] sm:$0xff]  ;;  %v311_v25 = vld [vmem:[%s5742_s27 + $0x38] sm:$0xff]  ;;  %v345_v26 = vld [vmem:[%s5730_s21 + $0x48] sm:$0xff] }
  0x17   : > { %5113 = vmatmul.mubr.msk.f32.vlgmr.msra.gmra.mxu0 %vm379_vm0, %v305_v14  ;;  %v312_v27 = vld [vmem:[%s5742_s27 + $0x40] sm:$0xff]  ;;  %v346_v28 = vld [vmem:[%s5730_s21 + $0x50] sm:$0xff]  ;;  %v313_v29 = vld [vmem:[%s5742_s27 + $0x48] sm:$0xff]  ;;  %5227 = vmatprep.subr.mxu1 %v7326_v2 }
  0x18   : > { %5172 = vmatmul.mubr.msk.f32.gmra.mxu1 %vm379_vm0, %v339_v12  ;;  %5115 = vmatprep.mubr.msk.f32.mxu0 %vm379_vm0, %v306_v16  ;;  %v347_v30 = vld [vmem:[%s5730_s21 + $0x58] sm:$0xff]  ;;  %v314_v31 = vld [vmem:[%s5742_s27 + $0x50] sm:$0xff]  ;;  %v348_v32 = vld [vmem:[%s5730_s21 + $0x60] sm:$0xff] }
  0x19   : > { %5174 = vmatprep.mubr.msk.f32.mxu1 %vm379_vm0, %v340_v15  ;;  %v315_v33 = vld [vmem:[%s5742_s27 + $0x58] sm:$0xff]  ;;  %v349_v34 = vld [vmem:[%s5730_s21 + $0x68] sm:$0xff]  ;;  %v316_v35 = vld [vmem:[%s5742_s27 + $0x60] sm:$0xff]  ;;  %5216 = vmatprep.subr.mxu0 %v7326_v2 }
  0x1a   : > { %v350_v36 = vld [vmem:[%s5730_s21 + $0x70] sm:$0xff]  ;;  %v317_v37 = vld [vmem:[%s5742_s27 + $0x68] sm:$0xff]  ;;  %v351_v38 = vld [vmem:[%s5730_s21 + $0x78] sm:$0xff] }
  0x1b   : > { %5116 = vmatmul.mubr.msk.f32.gmra.mxu0 %vm379_vm0, %v307_v18  ;;  %v318_v39 = vld [vmem:[%s5742_s27 + $0x70] sm:$0xff]  ;;  %v352_v40 = vld [vmem:[%s5730_s21 + $0x80] sm:$0xff]  ;;  %v319_v41 = vld [vmem:[%s5742_s27 + $0x78] sm:$0xff] }
  0x1c   : > { %5175 = vmatmul.mubr.msk.f32.gmra.mxu1 %vm379_vm0, %v341_v17  ;;  %5118 = vmatprep.mubr.msk.f32.mxu0 %vm379_vm0, %v308_v20  ;;  %v353_v42 = vld [vmem:[%s5730_s21 + $0x88] sm:$0xff]  ;;  %v320_v43 = vld [vmem:[%s5742_s27 + $0x80] sm:$0xff]  ;;  %v354_v44 = vld [vmem:[%s5730_s21 + $0x90] sm:$0xff] }
  0x1d   : > { %5177 = vmatprep.mubr.msk.f32.mxu1 %vm379_vm0, %v342_v19  ;;  %v321_v45 = vld [vmem:[%s5742_s27 + $0x88] sm:$0xff]  ;;  %v355_v46 = vld [vmem:[%s5730_s21 + $0x98] sm:$0xff]  ;;  %v322_v47 = vld [vmem:[%s5742_s27 + $0x90] sm:$0xff] }
  0x1e   : > { %v356_v48 = vld [vmem:[%s5730_s21 + $0xa0] sm:$0xff]  ;;  %v323_v49 = vld [vmem:[%s5742_s27 + $0x98] sm:$0xff]  ;;  %v357_v50 = vld [vmem:[%s5730_s21 + $0xa8] sm:$0xff] }
  0x1f   : > { %5119 = vmatmul.mubr.msk.f32.gmra.mxu0 %vm379_vm0, %v309_v21  ;;  %v324_v51 = vld [vmem:[%s5742_s27 + $0xa0] sm:$0xff]  ;;  %v358_v52 = vld [vmem:[%s5730_s21 + $0xb0] sm:$0xff]  ;;  %v325_v53 = vld [vmem:[%s5742_s27 + $0xa8] sm:$0xff] }
  0x20   : > { %5178 = vmatmul.mubr.msk.f32.gmra.mxu1 %vm379_vm0, %v343_v22  ;;  %5121 = vmatprep.mubr.msk.f32.mxu0 %vm379_vm0, %v310_v24  ;;  %v359_v54 = vld [vmem:[%s5730_s21 + $0xb8] sm:$0xff]  ;;  %v326_v55 = vld [vmem:[%s5742_s27 + $0xb0] sm:$0xff]  ;;  %v360_v56 = vld [vmem:[%s5730_s21 + $0xc0] sm:$0xff] }
  0x21   : > { %5180 = vmatprep.mubr.msk.f32.mxu1 %vm379_vm0, %v344_v23  ;;  %v361_v57 = vld [vmem:[%s5730_s21 + $0xc8] sm:$0xff]  ;;  %v362_v58 = vld [vmem:[%s5730_s21 + $0xd0] sm:$0xff]  ;;  %v363_v59 = vld [vmem:[%s5730_s21 + $0xd8] sm:$0xff] }
  0x22   : > { %v364_v60 = vld [vmem:[%s5730_s21 + $0xe0] sm:$0xff]  ;;  %v365_v61 = vld [vmem:[%s5730_s21 + $0xe8] sm:$0xff]  ;;  %v366_v62 = vld [vmem:[%s5730_s21 + $0xf0] sm:$0xff] }
  0x23   : > { %5122 = vmatmul.mubr.msk.f32.gmra.mxu0 %vm379_vm0, %v311_v25  ;;  %v367_v63 = vld [vmem:[%s5730_s21 + $0xf8] sm:$0xff]  ;;  %v328_v1 = vld [vmem:[%s5742_s27 + $0xc0] sm:$0xff]  ;;  %v329_v3 = vld [vmem:[%s5742_s27 + $0xc8] sm:$0xff] }
  0x24   : > { %5181 = vmatmul.mubr.msk.f32.gmra.mxu1 %vm379_vm0, %v345_v26  ;;  %5124 = vmatprep.mubr.msk.f32.mxu0 %vm379_vm0, %v312_v27  ;;  %v327_v0 = vld [vmem:[%s5742_s27 + $0xb8] sm:$0xff]  ;;  %v330_v4 = vld [vmem:[%s5742_s27 + $0xd0] sm:$0xff]  ;;  %v332_v6 = vld [vmem:[%s5742_s27 + $0xe0] sm:$0xff] }
  0x25   : > { %5183 = vmatprep.mubr.msk.f32.mxu1 %vm379_vm0, %v346_v28  ;;  %v331_v5 = vld [vmem:[%s5742_s27 + $0xd8] sm:$0xff]  ;;  %v333_v7 = vld [vmem:[%s5742_s27 + $0xe8] sm:$0xff]  ;;  %v334_v8 = vld [vmem:[%s5742_s27 + $0xf0] sm:$0xff] }
  0x26   : > { %v335_v9 = vld [vmem:[%s5742_s27 + $0xf8] sm:$0xff]  ;;  %v5896_v19 = vld [vmem:[%s7324_s6 + $0x10] sm:$0xff]  ;;  %v5914_v26 = vld [vmem:[%s7324_s6 + $0x8] sm:$0xff] }
  0x27   : > { %5125 = vmatmul.mubr.msk.f32.gmra.mxu0 %vm379_vm0, %v313_v29  ;;  %v5887_v13 = vld [vmem:[%s7324_s6 + $0x18] sm:$0xff] }
  0x28   : > { %5184 = vmatmul.mubr.msk.f32.gmra.mxu1 %vm379_vm0, %v347_v30  ;;  %5127 = vmatprep.mubr.msk.f32.mxu0 %vm379_vm0, %v314_v31 }
  0x29   : > { %5186 = vmatprep.mubr.msk.f32.mxu1 %vm379_vm0, %v348_v32 }
  0x2b   : > { %5128 = vmatmul.mubr.msk.f32.gmra.mxu0 %vm379_vm0, %v315_v33 }
  0x2c   : > { %5187 = vmatmul.mubr.msk.f32.gmra.mxu1 %vm379_vm0, %v349_v34  ;;  %5130 = vmatprep.mubr.msk.f32.mxu0 %vm379_vm0, %v316_v35  ;;  %v5935_v34 = vld [vmem:[%s7324_s6] sm:$0xff] }
  0x2d   : > { %5189 = vmatprep.mubr.msk.f32.mxu1 %vm379_vm0, %v350_v36 }
  0x2f   : > { %5131 = vmatmul.mubr.msk.f32.gmra.mxu0 %vm379_vm0, %v317_v37 }
  0x30   : > { %5190 = vmatmul.mubr.msk.f32.gmra.mxu1 %vm379_vm0, %v351_v38  ;;  %5133 = vmatprep.mubr.msk.f32.mxu0 %vm379_vm0, %v318_v39 }
  0x31   : > { %5192 = vmatprep.mubr.msk.f32.mxu1 %vm379_vm0, %v352_v40 }
  0x33   : > { %5134 = vmatmul.mubr.msk.f32.gmra.mxu0 %vm379_vm0, %v319_v41 }
  0x34   : > { %5193 = vmatmul.mubr.msk.f32.gmra.mxu1 %vm379_vm0, %v353_v42  ;;  %5136 = vmatprep.mubr.msk.f32.mxu0 %vm379_vm0, %v320_v43 }
  0x35   : > { %5195 = vmatprep.mubr.msk.f32.mxu1 %vm379_vm0, %v354_v44 }
  0x37   : > { %5137 = vmatmul.mubr.msk.f32.gmra.mxu0 %vm379_vm0, %v321_v45 }
  0x38   : > { %5196 = vmatmul.mubr.msk.f32.gmra.mxu1 %vm379_vm0, %v355_v46  ;;  %5139 = vmatprep.mubr.msk.f32.mxu0 %vm379_vm0, %v322_v47 }
  0x39   : > { %5198 = vmatprep.mubr.msk.f32.mxu1 %vm379_vm0, %v356_v48 }
  0x3b   : > { %5140 = vmatmul.mubr.msk.f32.gmra.mxu0 %vm379_vm0, %v323_v49 }
  0x3c   : > { %5199 = vmatmul.mubr.msk.f32.gmra.mxu1 %vm379_vm0, %v357_v50  ;;  %5142 = vmatprep.mubr.msk.f32.mxu0 %vm379_vm0, %v324_v51 }
  0x3d   : > { %5201 = vmatprep.mubr.msk.f32.mxu1 %vm379_vm0, %v358_v52 }
  0x3f   : > { %5143 = vmatmul.mubr.msk.f32.gmra.mxu0 %vm379_vm0, %v325_v53 }
  0x40   : > { %5202 = vmatmul.mubr.msk.f32.gmra.mxu1 %vm379_vm0, %v359_v54  ;;  %5145 = vmatprep.mubr.msk.f32.mxu0 %vm379_vm0, %v326_v55 }
  0x41   : > { %5204 = vmatprep.mubr.msk.f32.mxu1 %vm379_vm0, %v360_v56 }
  0x43   : > { %5146 = vmatmul.mubr.msk.f32.gmra.mxu0 %vm379_vm0, %v327_v0 }
  0x44   : > { %5205 = vmatmul.mubr.msk.f32.gmra.mxu1 %vm379_vm0, %v361_v57  ;;  %5148 = vmatprep.mubr.msk.f32.mxu0 %vm379_vm0, %v328_v1 }
  0x45   : > { %5207 = vmatprep.mubr.msk.f32.mxu1 %vm379_vm0, %v362_v58 }
  0x47   : > { %5149 = vmatmul.mubr.msk.f32.gmra.mxu0 %vm379_vm0, %v329_v3 }
  0x48   : > { %5208 = vmatmul.mubr.msk.f32.gmra.mxu1 %vm379_vm0, %v363_v59  ;;  %5151 = vmatprep.mubr.msk.f32.mxu0 %vm379_vm0, %v330_v4 }
  0x49   : > { %5210 = vmatprep.mubr.msk.f32.mxu1 %vm379_vm0, %v364_v60 }
  0x4b   : > { %5152 = vmatmul.mubr.msk.f32.gmra.mxu0 %vm379_vm0, %v331_v5 }
  0x4c   : > { %5211 = vmatmul.mubr.msk.f32.gmra.mxu1 %vm379_vm0, %v365_v61  ;;  %5154 = vmatprep.mubr.msk.f32.mxu0 %vm379_vm0, %v332_v6 }
  0x4d   : > { %5213 = vmatprep.mubr.msk.f32.mxu1 %vm379_vm0, %v366_v62 }
  0x4f   : > { %5155 = vmatmul.mubr.msk.f32.gmra.mxu0 %vm379_vm0, %v333_v7 }
  0x50   : > { %5214 = vmatmul.mubr.msk.f32.gmra.mxu1 %vm379_vm0, %v367_v63  ;;  %5157 = vmatprep.mubr.msk.f32.mxu0 %vm379_vm0, %v334_v8 }
  0x51   : > { %5235 = vmatprep.mubr.msk.f32.mxu1 %vm5654_vm1, %v7326_v2 }
  0x53   : > { %5158 = vmatmul.mubr.msk.f32.gmra.mxu0 %vm379_vm0, %v335_v9 }
  0x54   : > { %5224 = vmatprep.mubr.msk.f32.mxu0 %vm5654_vm1, %v7326_v2 }
  0x88   : > { %v5882_v10 = vpop.permute.xlu0 %705 }
  0xd4   : > { %v5170_v12 = vpop.f32.mrf.mxu1 }
  0xd5   : > { %v876_v14 = vadd.f32 %v5170_v12, %v5882_v10 }
  0xd6   : > { %v870_v15 = vpop.f32.mrf.mxu1 }
  0xd7   : > { %v871_v16 = vadd.f32 %v870_v15, %v5882_v10  ;;  %3915 = vrot.lane.b32.xlu1 %v876_v14, %s5652_s30  ;;  %v1040_v17 = vmul.f32 %v5887_v13, %v876_v14  ;;  %v1039_v23 = vmul.f32 %v5896_v19, %v876_v14  ;;  %v1038_v30 = vmul.f32 %v5914_v26, %v876_v14  ;;  %v5114_v31 = vpop.f32.mrf.mxu0 }
  0xd8   : > { %v5173_v18 = vpop.f32.mrf.mxu1  ;;  %v1037_v38 = vmul.f32 %v5935_v34, %v876_v14  ;;  %v548_v42 = vadd.f32 %v5114_v31, %v5748_v11 }
  0xd9   : > { %5228 = vmatpush3.xpose.msk.msra.mxu1 %vm379_vm0, %v1040_v17  ;;  %3913 = vrot.lane.b32.xlu0 %v871_v16, %s5652_s30  ;;  %v1036_v20 = vmul.f32 %v5887_v13, %v871_v16  ;;  %v5908_v24 = vadd.f32 %v5173_v18, %v5882_v10  ;;  %v1035_v27 = vmul.f32 %v5896_v19, %v871_v16  ;;  %v542_v39 = vpop.f32.mrf.mxu0 }
  0xda   : > { %v880_v21 = vpop.f32.mrf.mxu1  ;;  %5229 = vmatprep.subr.mxu1 %v7326_v2  ;;  %v1034_v35 = vmul.f32 %v5914_v26, %v871_v16  ;;  %v1033_v43 = vmul.f32 %v5935_v34, %v871_v16  ;;  %v543_v45 = vadd.f32 %v5748_v11, %v542_v39 }
  0xdb   : > { %v5903_v22 = vadd.f32 %v880_v21, %v5882_v10  ;;  %5217 = vmatpush3.xpose.msk.msra.mxu0 %vm379_vm0, %v1036_v20  ;;  %v1048_v47 = vmul.f32 %v5887_v13, %v5908_v24  ;;  %v1047_v54 = vmul.f32 %v5896_v19, %v5908_v24  ;;  %v5117_v60 = vpop.f32.mrf.mxu0  ;;  %v1046_v63 = vmul.f32 %v5914_v26, %v5908_v24 }
  0xdc   : > { %v5176_v25 = vpop.f32.mrf.mxu1  ;;  %5218 = vmatprep.subr.mxu0 %v7326_v2  ;;  %v1045_v18 = vmul.f32 %v5935_v34, %v5908_v24 }
  0xdd   : > { %5230 = vmatpush3.xpose.msk.msra.mxu1 %vm379_vm0, %v1039_v23  ;;  %3917 = vrot.lane.b32.xlu1 %v5903_v22, %s5652_s30  ;;  %v5929_v32 = vadd.f32 %v5176_v25, %v5882_v10  ;;  %v1044_v51 = vmul.f32 %v5887_v13, %v5903_v22  ;;  %v1043_v59 = vmul.f32 %v5896_v19, %v5903_v22  ;;  %v552_v14 = vpop.f32.mrf.mxu0 }
  0xde   : > { %3919 = vrot.lane.b32.xlu0 %v5908_v24, %s5652_s30  ;;  %v890_v28 = vpop.f32.mrf.mxu1  ;;  %5231 = vmatprep.subr.mxu1 %v7326_v2  ;;  %v1042_v7 = vmul.f32 %v5914_v26, %v5903_v22  ;;  %v553_v31 = vadd.f32 %v5748_v11, %v552_v14 }
  0xdf   : > { %v5924_v29 = vadd.f32 %v890_v28, %v5882_v10  ;;  %5219 = vmatpush3.xpose.msk.msra.mxu0 %vm379_vm0, %v1035_v27 }
  0xe0   : > { %v5179_v33 = vpop.f32.mrf.mxu1  ;;  %5220 = vmatprep.subr.mxu0 %v7326_v2 }
  0xe1   : > { %5232 = vmatpush3.xpose.msk.msra.mxu1 %vm379_vm0, %v1038_v30  ;;  %3921 = vrot.lane.b32.xlu1 %v5924_v29, %s5652_s30  ;;  %v5950_v40 = vadd.f32 %v5179_v33, %v5882_v10  ;;  %v558_v30 = vadd.f32 %v5117_v60, %v5748_v11  ;;  %v1041_v33 = vmul.f32 %v5935_v34, %v5903_v22 }
  0xe2   : > { %3923 = vrot.lane.b32.xlu0 %v5929_v32, %s5652_s30  ;;  %v900_v36 = vpop.f32.mrf.mxu1  ;;  %5233 = vmatprep.subr.mxu1 %v7326_v2  ;;  %v1056_v22 = vmul.f32 %v5887_v13, %v5929_v32 }
  0xe3   : > { %v5945_v37 = vadd.f32 %v900_v36, %v5882_v10  ;;  %5221 = vmatpush3.xpose.msk.msra.mxu0 %vm379_vm0, %v1034_v35 }
  0xe4   : > { %v5182_v41 = vpop.f32.mrf.mxu1  ;;  %5222 = vmatprep.subr.mxu0 %v7326_v2 }
  0xe5   : > { %5234 = vmatpush3.xpose.msk.msra.mxu1 %vm379_vm0, %v1037_v38  ;;  %3925 = vrot.lane.b32.xlu1 %v5945_v37, %s5652_s30  ;;  %v5969_v48 = vadd.f32 %v5182_v41, %v5882_v10 }
  0xe6   : > { %3927 = vrot.lane.b32.xlu0 %v5950_v40, %s5652_s30  ;;  %v910_v44 = vpop.f32.mrf.mxu1  ;;  %5249 = vmatprep.subr.mxu1 %v7326_v2 }
  0xe7   : > { %v5963_v46 = vadd.f32 %v910_v44, %v5882_v10  ;;  %5223 = vmatpush3.xpose.msk.msra.mxu0 %vm379_vm0, %v1033_v43 }
  0xe8   : > { %v5185_v49 = vpop.f32.mrf.mxu1  ;;  %5236 = vmatmul.mubr.msk.f32.vlgmr.msra.gmra.mxu1 %vm379_vm0, %v548_v42  ;;  %5238 = vmatprep.subr.mxu0 %v7326_v2 }
  0xe9   : > { %v5974_v50 = vadd.f32 %v5185_v49, %v5882_v10  ;;  %3929 = vrot.lane.b32.xlu1 %v5963_v46, %s5652_s30  ;;  %5250 = vmatpush3.xpose.msk.msra.mxu1 %vm379_vm0, %v1048_v47 }
  0xea   : > { %3931 = vrot.lane.b32.xlu0 %v5969_v48, %s5652_s30  ;;  %v920_v52 = vpop.f32.mrf.mxu1  ;;  %5225 = vmatmul.mubr.msk.f32.vlgmr.msra.gmra.mxu0 %vm379_vm0, %v543_v45 }
  0xeb   : > { %v5985_v53 = vadd.f32 %v920_v52, %v5882_v10  ;;  %5239 = vmatpush3.xpose.msk.msra.mxu0 %vm379_vm0, %v1044_v51  ;;  %5251 = vmatprep.subr.mxu1 %v7326_v2  ;;  %v5996_v56 = vmul.f32 %v5914_v26, %v5974_v50  ;;  %v6000_v57 = vmul.f32 %v5935_v34, %v5974_v50 }
  0xec   : > { %v5188_v55 = vpop.f32.mrf.mxu1  ;;  %5240 = vmatprep.subr.mxu0 %v7326_v2  ;;  %5257 = vmatprep.mubr.msk.f32.mxu1 %vm5654_vm1, %v7326_v2  ;;  %v1052_v52 = vmul.f32 %v5887_v13, %v5924_v29 }
  0xed   : > { %v936_v58 = vadd.f32 %v5188_v55, %v5882_v10  ;;  %3933 = vrot.lane.b32.xlu1 %v5985_v53, %s5652_s30  ;;  %5252 = vmatpush3.xpose.msk.msra.mxu1 %vm379_vm0, %v1047_v54  ;;  %v6010_v61 = vmul.f32 %v5896_v19, %v5985_v53  ;;  %v6019_v0 = vmul.f32 %v5914_v26, %v5985_v53 }
  0xee   : > { %3935 = vrot.lane.b32.xlu0 %v5974_v50, %s5652_s30  ;;  %v930_v62 = vpop.f32.mrf.mxu1  ;;  %5253 = vmatprep.subr.mxu1 %v7326_v2  ;;  %v6023_v1 = vmul.f32 %v5935_v34, %v5985_v53 }
  0xef   : > { %v931_v3 = vadd.f32 %v930_v62, %v5882_v10  ;;  %5241 = vmatpush3.xpose.msk.msra.mxu0 %vm379_vm0, %v1043_v59  ;;  %5246 = vmatprep.mubr.msk.f32.mxu0 %vm5654_vm1, %v7326_v2  ;;  %v6030_v4 = vmul.f32 %v5887_v13, %v936_v58  ;;  %v6033_v5 = vmul.f32 %v5896_v19, %v936_v58 }
  0xf0   : > { %v5191_v6 = vpop.f32.mrf.mxu1  ;;  %5242 = vmatprep.subr.mxu0 %v7326_v2  ;;  %v6039_v8 = vmul.f32 %v5914_v26, %v936_v58  ;;  %v6042_v9 = vmul.f32 %v5935_v34, %v936_v58  ;;  %v1055_v62 = vmul.f32 %v5896_v19, %v5929_v32 }
  0xf1   : > { %v946_v12 = vadd.f32 %v5191_v6, %v5882_v10  ;;  %3937 = vrot.lane.b32.xlu1 %v931_v3, %s5652_s30  ;;  %5254 = vmatpush3.xpose.msk.msra.mxu1 %vm379_vm0, %v1046_v63  ;;  %v6048_v15 = vmul.f32 %v5887_v13, %v931_v3  ;;  %v6051_v16 = vmul.f32 %v5896_v19, %v931_v3 }
  0xf2   : > { %3939 = vrot.lane.b32.xlu0 %v936_v58, %s5652_s30  ;;  %v940_v17 = vpop.f32.mrf.mxu1  ;;  %5255 = vmatprep.subr.mxu1 %v7326_v2  ;;  %v6058_v20 = vmul.f32 %v5914_v26, %v931_v3  ;;  %v6061_v21 = vmul.f32 %v5935_v34, %v931_v3 }
  0xf3   : > { %v941_v23 = vadd.f32 %v940_v17, %v5882_v10  ;;  %5243 = vmatpush3.xpose.msk.msra.mxu0 %vm379_vm0, %v1042_v7  ;;  %v6066_v25 = vmul.f32 %v5887_v13, %v946_v12  ;;  %v6069_v27 = vmul.f32 %v5896_v19, %v946_v12  ;;  %v6072_v28 = vmul.f32 %v5914_v26, %v946_v12 }
  0xf4   : > { %v5194_v24 = vpop.f32.mrf.mxu1  ;;  %5244 = vmatprep.subr.mxu0 %v7326_v2  ;;  %v6080_v35 = vmul.f32 %v5935_v34, %v946_v12  ;;  %v1051_v17 = vmul.f32 %v5896_v19, %v5924_v29 }
  0xf5   : > { %v956_v36 = vadd.f32 %v5194_v24, %v5882_v10  ;;  %3941 = vrot.lane.b32.xlu1 %v941_v23, %s5652_s30  ;;  %5256 = vmatpush3.xpose.msk.msra.mxu1 %vm379_vm0, %v1045_v18  ;;  %v6086_v38 = vmul.f32 %v5887_v13, %v941_v23  ;;  %v6089_v39 = vmul.f32 %v5896_v19, %v941_v23 }
  0xf6   : > { %3943 = vrot.lane.b32.xlu0 %v946_v12, %s5652_s30  ;;  %v950_v41 = vpop.f32.mrf.mxu1  ;;  %5271 = vmatprep.subr.mxu1 %v7326_v2  ;;  %v6096_v42 = vmul.f32 %v5914_v26, %v941_v23  ;;  %v6099_v43 = vmul.f32 %v5935_v34, %v941_v23 }
  0xf7   : > { %v951_v44 = vadd.f32 %v950_v41, %v5882_v10  ;;  %5245 = vmatpush3.xpose.msk.msra.mxu0 %vm379_vm0, %v1041_v33  ;;  %v6104_v45 = vmul.f32 %v5887_v13, %v956_v36  ;;  %v6107_v47 = vmul.f32 %v5896_v19, %v956_v36  ;;  %v6110_v49 = vmul.f32 %v5914_v26, %v956_v36 }
  0xf8   : > { %v5197_v51 = vpop.f32.mrf.mxu1  ;;  %5258 = vmatmul.mubr.msk.f32.vlgmr.msra.gmra.mxu1 %vm379_vm0, %v558_v30  ;;  %5260 = vmatprep.subr.mxu0 %v7326_v2  ;;  %v6117_v54 = vmul.f32 %v5935_v34, %v956_v36  ;;  %v5120_v30 = vpop.f32.mrf.mxu0  ;;  %v1054_v41 = vmul.f32 %v5914_v26, %v5929_v32 }
  0xf9   : > { %v966_v55 = vadd.f32 %v5197_v51, %v5882_v10  ;;  %3945 = vrot.lane.b32.xlu1 %v951_v44, %s5652_s30  ;;  %5272 = vmatpush3.xpose.msk.msra.mxu1 %vm379_vm0, %v1056_v22  ;;  %v6123_v58 = vmul.f32 %v5887_v13, %v951_v44  ;;  %v6126_v59 = vmul.f32 %v5896_v19, %v951_v44 }
  0xfa   : > { %3947 = vrot.lane.b32.xlu0 %v956_v36, %s5652_s30  ;;  %v960_v60 = vpop.f32.mrf.mxu1  ;;  %5247 = vmatmul.mubr.msk.f32.vlgmr.msra.gmra.mxu0 %vm379_vm0, %v553_v31  ;;  %v6133_v63 = vmul.f32 %v5914_v26, %v951_v44  ;;  %v6136_v3 = vmul.f32 %v5935_v34, %v951_v44 }
  0xfb   : > { %v961_v6 = vadd.f32 %v960_v60, %v5882_v10  ;;  %5261 = vmatpush3.xpose.msk.msra.mxu0 %vm379_vm0, %v1052_v52  ;;  %5273 = vmatprep.subr.mxu1 %v7326_v2  ;;  %v6142_v7 = vmul.f32 %v5887_v13, %v966_v55  ;;  %v6145_v12 = vmul.f32 %v5896_v19, %v966_v55 }
  0xfc   : > { %v5200_v14 = vpop.f32.mrf.mxu1  ;;  %5262 = vmatprep.subr.mxu0 %v7326_v2  ;;  %5279 = vmatprep.mubr.msk.f32.mxu1 %vm5654_vm1, %v7326_v2  ;;  %v6153_v18 = vmul.f32 %v5914_v26, %v966_v55  ;;  %v6156_v23 = vmul.f32 %v5935_v34, %v966_v55 }
  0xfd   : > { %v976_v24 = vadd.f32 %v5200_v14, %v5882_v10  ;;  %3949 = vrot.lane.b32.xlu1 %v961_v6, %s5652_s30  ;;  %5274 = vmatpush3.xpose.msk.msra.mxu1 %vm379_vm0, %v1055_v62  ;;  %v6162_v31 = vmul.f32 %v5887_v13, %v961_v6  ;;  %v6165_v33 = vmul.f32 %v5896_v19, %v961_v6 }
  0xfe   : > { %7328 = vst [vmem:[#allocation2_spill] sm:$0xff] %v6156_v23  ;;  %3951 = vrot.lane.b32.xlu0 %v966_v55, %s5652_s30  ;;  %v970_v36 = vpop.f32.mrf.mxu1  ;;  %5275 = vmatprep.subr.mxu1 %v7326_v2  ;;  %v6172_v22 = vmul.f32 %v5914_v26, %v961_v6  ;;  %v6175_v44 = vmul.f32 %v5935_v34, %v961_v6 }
  0xff   : > { %v971_v51 = vadd.f32 %v970_v36, %v5882_v10  ;;  %5263 = vmatpush3.xpose.msk.msra.mxu0 %vm379_vm0, %v1051_v17  ;;  %5268 = vmatprep.mubr.msk.f32.mxu0 %vm5654_vm1, %v7326_v2  ;;  %v6182_v52 = vmul.f32 %v5887_v13, %v976_v24  ;;  %v6185_v55 = vmul.f32 %v5896_v19, %v976_v24  ;;  %v562_v36 = vpop.f32.mrf.mxu0 }
 0x100   : > { %7329 = vst [vmem:[#allocation3_spill] sm:$0xff] %v6175_v44  ;;  %v5203_v60 = vpop.f32.mrf.mxu1  ;;  %5264 = vmatprep.subr.mxu0 %v7326_v2  ;;  %v1050_v62 = vmul.f32 %v5914_v26, %v5924_v29  ;;  %v6191_v6 = vmul.f32 %v5914_v26, %v976_v24  ;;  %v6194_v14 = vmul.f32 %v5935_v34, %v976_v24 }
 0x101   : > { %7330 = vst [vmem:[#allocation4_spill] sm:$0xff] %v6182_v52  ;;  %7331 = vst [vmem:[#allocation5_spill] sm:$0xff] %v6185_v55  ;;  %v986_v17 = vadd.f32 %v5203_v60, %v5882_v10  ;;  %3953 = vrot.lane.b32.xlu1 %v971_v51, %s5652_s30  ;;  %5276 = vmatpush3.xpose.msk.msra.mxu1 %vm379_vm0, %v1054_v41  ;;  %v6200_v55 = vmul.f32 %v5887_v13, %v971_v51 }
 0x102   : > { %7332 = vst [vmem:[#allocation6_spill] sm:$0xff] %v6191_v6  ;;  %7333 = vst [vmem:[#allocation7_spill] sm:$0xff] %v6194_v14  ;;  %v6203_v2 = vmul.f32 %v5896_v19, %v971_v51  ;;  %3955 = vrot.lane.b32.xlu0 %v976_v24, %s5652_s30  ;;  %v980_v52 = vpop.f32.mrf.mxu1  ;;  %v7336_v6 = vmov 0.0   ;;  %v1053_v14 = vmul.f32 %v5935_v34, %v5929_v32  ;;  %v6210_v60 = vmul.f32 %v5914_v26, %v971_v51 }
 0x103   : > { %7334 = vst [vmem:[#allocation8_spill] sm:$0xff] %v6200_v55  ;;  %5277 = vmatprep.subr.mxu1 %v7336_v6  ;;  %v6213_v41 = vmul.f32 %v5935_v34, %v971_v51  ;;  %v981_v44 = vadd.f32 %v980_v52, %v5882_v10  ;;  %5265 = vmatpush3.xpose.msk.msra.mxu0 %vm379_vm0, %v1050_v62 }
 0x104   : > { %7335 = vst [vmem:[#allocation9_spill] sm:$0xff] %v6203_v2  ;;  %v6218_v2 = vmul.f32 %v5887_v13, %v986_v17  ;;  %v6221_v24 = vmul.f32 %v5896_v19, %v986_v17  ;;  %v6224_v55 = vmul.f32 %v5914_v26, %v986_v17  ;;  %v5206_v32 = vpop.f32.mrf.mxu1  ;;  %v568_v23 = vadd.f32 %v5120_v30, %v5748_v11 }
 0x105   : > { %5266 = vmatprep.subr.mxu0 %v7336_v6  ;;  %v563_v51 = vadd.f32 %v5748_v11, %v562_v36  ;;  %v1049_v52 = vmul.f32 %v5935_v34, %v5924_v29  ;;  %v6232_v62 = vmul.f32 %v5935_v34, %v986_v17  ;;  %3957 = vrot.lane.b32.xlu1 %v981_v44, %s5652_s30 }
 0x106   : > { %7337 = vst [vmem:[#allocation10_spill] sm:$0xff] %v6218_v2  ;;  %7338 = vst [vmem:[#allocation11_spill] sm:$0xff] %v6221_v24  ;;  %v996_v2 = vadd.f32 %v5206_v32, %v5882_v10  ;;  %5278 = vmatpush3.xpose.msk.msra.mxu1 %vm379_vm0, %v1053_v14  ;;  %v6240_v30 = vmul.f32 %v5887_v13, %v981_v44  ;;  %3959 = vrot.lane.b32.xlu0 %v986_v17, %s5652_s30  ;;  %v990_v36 = vpop.f32.mrf.mxu1 }
 0x107   : > { %7339 = vst [vmem:[#allocation12_spill] sm:$0xff] %v6224_v55  ;;  %7340 = vst [vmem:[#allocation13_spill] sm:$0xff] %v6232_v62  ;;  %v1064_v55 = vmul.f32 %v5887_v13, %v5950_v40  ;;  %5293 = vmatprep.subr.mxu1 %v7336_v6  ;;  %v6245_v29 = vmul.f32 %v5896_v19, %v981_v44  ;;  %v6248_v32 = vmul.f32 %v5914_v26, %v981_v44 }
 0x108   : > { %7341 = vst [vmem:[#allocation14_spill] sm:$0xff] %v6240_v30  ;;  %v6251_v62 = vmul.f32 %v5935_v34, %v981_v44  ;;  %v991_v14 = vadd.f32 %v990_v36, %v5882_v10  ;;  %5267 = vmatpush3.xpose.msk.msra.mxu0 %vm379_vm0, %v1049_v52  ;;  %v6256_v24 = vmul.f32 %v5887_v13, %v996_v2 }
 0x109   : > { %7342 = vst [vmem:[#allocation15_spill] sm:$0xff] %v6245_v29  ;;  %v6259_v17 = vmul.f32 %v5896_v19, %v996_v2  ;;  %v6262_v30 = vmul.f32 %v5914_v26, %v996_v2  ;;  %v5209_v29 = vpop.f32.mrf.mxu1  ;;  %5280 = vmatmul.mubr.msk.f32.vlgmr.msra.gmra.mxu1 %vm379_vm0, %v568_v23  ;;  %5282 = vmatprep.subr.mxu0 %v7336_v6 }
 0x10a   : > { %7343 = vst [vmem:[#allocation16_spill] sm:$0xff] %v6251_v62  ;;  %7344 = vst [vmem:[#allocation17_spill] sm:$0xff] %v6256_v24  ;;  %v1060_v44 = vmul.f32 %v5887_v13, %v5945_v37  ;;  %v6269_v36 = vmul.f32 %v5935_v34, %v996_v2  ;;  %v1006_v52 = vadd.f32 %v5209_v29, %v5882_v10  ;;  %3961 = vrot.lane.b32.xlu1 %v991_v14, %s5652_s30 }
 0x10b   : > { %7345 = vst [vmem:[#allocation18_spill] sm:$0xff] %v6259_v17  ;;  %7346 = vst [vmem:[#allocation19_spill] sm:$0xff] %v6262_v30  ;;  %5294 = vmatpush3.xpose.msk.msra.mxu1 %vm379_vm0, %v1064_v55  ;;  %v6275_v17 = vmul.f32 %v5887_v13, %v991_v14  ;;  %v6278_v30 = vmul.f32 %v5896_v19, %v991_v14  ;;  %3963 = vrot.lane.b32.xlu0 %v996_v2, %s5652_s30  ;;  %v1000_v23 = vpop.f32.mrf.mxu1 }
 0x10c   : > { %7347 = vst [vmem:[#allocation20_spill] sm:$0xff] %v6269_v36  ;;  %5269 = vmatmul.mubr.msk.f32.vlgmr.msra.gmra.mxu0 %vm379_vm0, %v563_v51  ;;  %v1063_v36 = vmul.f32 %v5896_v19, %v5950_v40  ;;  %v6285_v29 = vmul.f32 %v5914_v26, %v991_v14  ;;  %v6288_v24 = vmul.f32 %v5935_v34, %v991_v14 }
 0x10d   : > { %7348 = vst [vmem:[#allocation21_spill] sm:$0xff] %v6275_v17  ;;  %7349 = vst [vmem:[#allocation22_spill] sm:$0xff] %v6278_v30  ;;  %v1001_v55 = vadd.f32 %v1000_v23, %v5882_v10  ;;  %5283 = vmatpush3.xpose.msk.msra.mxu0 %vm379_vm0, %v1060_v44  ;;  %5295 = vmatprep.subr.mxu1 %v7336_v6  ;;  %v6294_v2 = vmul.f32 %v5887_v13, %v1006_v52  ;;  %v5212_v30 = vpop.f32.mrf.mxu1 }
 0x10e   : > { %7350 = vst [vmem:[#allocation23_spill] sm:$0xff] %v6285_v29  ;;  %7351 = vst [vmem:[#allocation24_spill] sm:$0xff] %v6288_v24  ;;  %v6297_v51 = vmul.f32 %v5896_v19, %v1006_v52  ;;  %5284 = vmatprep.subr.mxu0 %v7336_v6  ;;  %v1059_v29 = vmul.f32 %v5896_v19, %v5945_v37  ;;  %5301 = vmatprep.mubr.msk.f32.mxu1 %vm5654_vm1, %v7336_v6 }
 0x10f   : > { %7352 = vst [vmem:[#allocation25_spill] sm:$0xff] %v6294_v2  ;;  %v6305_v14 = vmul.f32 %v5914_v26, %v1006_v52  ;;  %v6308_v44 = vmul.f32 %v5935_v34, %v1006_v52  ;;  %v1016_v23 = vadd.f32 %v5212_v30, %v5882_v10  ;;  %3965 = vrot.lane.b32.xlu1 %v1001_v55, %s5652_s30  ;;  %v1010_v24 = vpop.f32.mrf.mxu1 }
 0x110   : > { %7353 = vst [vmem:[#allocation26_spill] sm:$0xff] %v6297_v51  ;;  %5296 = vmatpush3.xpose.msk.msra.mxu1 %vm379_vm0, %v1063_v36  ;;  %v6314_v51 = vmul.f32 %v5887_v13, %v1001_v55  ;;  %v6317_v2 = vmul.f32 %v5896_v19, %v1001_v55  ;;  %3967 = vrot.lane.b32.xlu0 %v1006_v52, %s5652_s30 }
 0x111   : > { %7354 = vst [vmem:[#allocation27_spill] sm:$0xff] %v6305_v14  ;;  %7355 = vst [vmem:[#allocation28_spill] sm:$0xff] %v6308_v44  ;;  %5297 = vmatprep.subr.mxu1 %v7336_v6  ;;  %v1062_v44 = vmul.f32 %v5914_v26, %v5950_v40  ;;  %v6324_v30 = vmul.f32 %v5914_v26, %v1001_v55  ;;  %v6327_v14 = vmul.f32 %v5935_v34, %v1001_v55  ;;  %v5215_v17 = vpop.f32.mrf.mxu1 }
 0x112   : > { %7356 = vst [vmem:[#allocation29_spill] sm:$0xff] %v6314_v51  ;;  %7357 = vst [vmem:[#allocation30_spill] sm:$0xff] %v6317_v2  ;;  %v1011_v36 = vadd.f32 %v1010_v24, %v5882_v10  ;;  %5285 = vmatpush3.xpose.msk.msra.mxu0 %vm379_vm0, %v1059_v29  ;;  %v5123_v51 = vpop.f32.mrf.mxu0  ;;  %5290 = vmatprep.mubr.msk.f32.mxu0 %vm5654_vm1, %v7336_v6  ;;  %v6334_v52 = vmul.f32 %v5887_v13, %v1016_v23 }
 0x113   : > { %7358 = vst [vmem:[#allocation31_spill] sm:$0xff] %v6324_v30  ;;  %7359 = vst [vmem:[#allocation32_spill] sm:$0xff] %v6327_v14  ;;  %v6337_v2 = vmul.f32 %v5896_v19, %v1016_v23  ;;  %5286 = vmatprep.subr.mxu0 %v7336_v6  ;;  %v1058_v55 = vmul.f32 %v5914_v26, %v5945_v37  ;;  %v6343_v24 = vmul.f32 %v5914_v26, %v1016_v23  ;;  %v1020_v30 = vpop.f32.mrf.mxu1 }
 0x114   : > { %7360 = vst [vmem:[#allocation33_spill] sm:$0xff] %v6334_v52  ;;  %v6346_v29 = vmul.f32 %v5935_v34, %v1016_v23  ;;  %v1026_v14 = vadd.f32 %v5215_v17, %v5882_v10  ;;  %3969 = vrot.lane.b32.xlu1 %v1011_v36, %s5652_s30  ;;  %5298 = vmatpush3.xpose.msk.msra.mxu1 %vm379_vm0, %v1062_v44 }
 0x115   : > { %7361 = vst [vmem:[#allocation34_spill] sm:$0xff] %v6337_v2  ;;  %7362 = vst [vmem:[#allocation35_spill] sm:$0xff] %v6343_v24  ;;  %v6352_v2 = vmul.f32 %v5887_v13, %v1011_v36  ;;  %v6355_v52 = vmul.f32 %v5896_v19, %v1011_v36  ;;  %3971 = vrot.lane.b32.xlu0 %v1016_v23, %s5652_s30  ;;  %5299 = vmatprep.subr.mxu1 %v7336_v6 }
 0x116   : > { %7363 = vst [vmem:[#allocation36_spill] sm:$0xff] %v6346_v29  ;;  %v1061_v29 = vmul.f32 %v5935_v34, %v5950_v40  ;;  %v6362_v17 = vmul.f32 %v5914_v26, %v1011_v36  ;;  %v6365_v24 = vmul.f32 %v5935_v34, %v1011_v36  ;;  %v1021_v44 = vadd.f32 %v1020_v30, %v5882_v10 }
 0x117   : > { %7364 = vst [vmem:[#allocation37_spill] sm:$0xff] %v6352_v2  ;;  %7365 = vst [vmem:[#allocation38_spill] sm:$0xff] %v6355_v52  ;;  %5287 = vmatpush3.xpose.msk.msra.mxu0 %vm379_vm0, %v1058_v55  ;;  %v572_v2 = vpop.f32.mrf.mxu0  ;;  %v6370_v52 = vmul.f32 %v5887_v13, %v1026_v14  ;;  %v6373_v23 = vmul.f32 %v5896_v19, %v1026_v14  ;;  %v6376_v62 = vmul.f32 %v5914_v26, %v1026_v14 }
 0x118   : > { %v578_v40 = vadd.f32 %v5123_v51, %v5748_v11  ;;  %5288 = vmatprep.subr.mxu0 %v7336_v6  ;;  %v6381_v36 = vmul.f32 %v5935_v34, %v1026_v14  ;;  %3973 = vrot.lane.b32.xlu1 %v1021_v44, %s5652_s30  ;;  %v1057_v10 = vmul.f32 %v5935_v34, %v5945_v37 }
 0x119   : > { %5300 = vmatpush3.xpose.msk.msra.mxu1 %vm379_vm0, %v1061_v29  ;;  %v6388_v30 = vmul.f32 %v5887_v13, %v1021_v44  ;;  %v6391_v55 = vmul.f32 %v5896_v19, %v1021_v44  ;;  %3975 = vrot.lane.b32.xlu0 %v1026_v14, %s5652_s30  ;;  %v573_v51 = vadd.f32 %v5748_v11, %v572_v2 }
 0x11a   : > { %7366 = vst [vmem:[#allocation39_spill] sm:$0xff] %v6381_v36  ;;  %5315 = vmatprep.subr.mxu1 %v7336_v6  ;;  %v6397_v36 = vmul.f32 %v5914_v26, %v1021_v44  ;;  %v6400_v29 = vmul.f32 %v5935_v34, %v1021_v44  ;;  %v1072_v37 = vmul.f32 %v5887_v13, %v5969_v48 }
 0x11b   : > { %5289 = vmatpush3.xpose.msk.msra.mxu0 %vm379_vm0, %v1057_v10  ;;  %v1068_v2 = vmul.f32 %v5887_v13, %v5963_v46  ;;  %v1071_v14 = vmul.f32 %v5896_v19, %v5969_v48  ;;  %v1067_v44 = vmul.f32 %v5896_v19, %v5963_v46  ;;  %v5126_v10 = vpop.f32.mrf.mxu0 }
 0x11c   : > { %5302 = vmatmul.mubr.msk.f32.vlgmr.msra.gmra.mxu1 %vm379_vm0, %v578_v40  ;;  %5304 = vmatprep.subr.mxu0 %v7336_v6  ;;  %v1070_v40 = vmul.f32 %v5914_v26, %v5969_v48 }
 0x11d   : > { %5316 = vmatpush3.xpose.msk.msra.mxu1 %vm379_vm0, %v1072_v37  ;;  %5323 = vmatprep.mubr.msk.f32.mxu1 %vm5654_vm1, %v7336_v6  ;;  %v1069_v37 = vmul.f32 %v5935_v34, %v5969_v48  ;;  %v1076_v48 = vmul.f32 %v5887_v13, %v5985_v53 }
 0x11e   : > { %5291 = vmatmul.mubr.msk.f32.vlgmr.msra.gmra.mxu0 %vm379_vm0, %v573_v51  ;;  %5317 = vmatprep.subr.mxu1 %v7336_v6  ;;  %v1066_v51 = vmul.f32 %v5914_v26, %v5963_v46  ;;  %v1080_v26 = vmul.f32 %v5887_v13, %v5974_v50 }
 0x11f   : > { %5305 = vmatpush3.xpose.msk.msra.mxu0 %vm379_vm0, %v1068_v2  ;;  %5312 = vmatprep.mubr.msk.f32.mxu0 %vm5654_vm1, %v7336_v6  ;;  %v582_v2 = vpop.f32.mrf.mxu0 }
 0x120   : > { %5306 = vmatprep.subr.mxu0 %v7336_v6 }
 0x121   : > { %5318 = vmatpush3.xpose.msk.msra.mxu1 %vm379_vm0, %v1071_v14  ;;  %v588_v14 = vadd.f32 %v5126_v10, %v5748_v11  ;;  %v5129_v13 = vpop.f32.mrf.mxu0 }
 0x122   : > { %5319 = vmatprep.subr.mxu1 %v7336_v6 }
 0x123   : > { %5307 = vmatpush3.xpose.msk.msra.mxu0 %vm379_vm0, %v1067_v44  ;;  %v1065_v44 = vmul.f32 %v5935_v34, %v5963_v46  ;;  %v1079_v34 = vmul.f32 %v5896_v19, %v5974_v50  ;;  %v592_v19 = vpop.f32.mrf.mxu0  ;;  %v598_v46 = vadd.f32 %v5129_v13, %v5748_v11  ;;  %v7386_v13 = vld [vmem:[#allocation19_spill] sm:$0xff] }
 0x124   : > { %5308 = vmatprep.subr.mxu0 %v7336_v6  ;;  %v593_v50 = vadd.f32 %v5748_v11, %v592_v19 }
 0x125   : > { %5320 = vmatpush3.xpose.msk.msra.mxu1 %vm379_vm0, %v1070_v40  ;;  %v583_v40 = vadd.f32 %v5748_v11, %v582_v2  ;;  %v5132_v11 = vpop.f32.mrf.mxu0 }
 0x126   : > { %5321 = vmatprep.subr.mxu1 %v7336_v6 }
 0x127   : > { %5309 = vmatpush3.xpose.msk.msra.mxu0 %vm379_vm0, %v1066_v51  ;;  %v602_v53 = vpop.f32.mrf.mxu0  ;;  %v7380_v51 = vld [vmem:[#allocation13_spill] sm:$0xff] }
 0x128   : > { %5310 = vmatprep.subr.mxu0 %v7336_v6 }
 0x129   : > { %5322 = vmatpush3.xpose.msk.msra.mxu1 %vm379_vm0, %v1069_v37 }
 0x12a   : > { %5337 = vmatprep.subr.mxu1 %v7336_v6 }
 0x12b   : > { %5311 = vmatpush3.xpose.msk.msra.mxu0 %vm379_vm0, %v1065_v44 }
 0x12c   : > { %5324 = vmatmul.mubr.msk.f32.vlgmr.msra.gmra.mxu1 %vm379_vm0, %v588_v14  ;;  %5326 = vmatprep.subr.mxu0 %v7336_v6  ;;  %v7381_v14 = vld [vmem:[#allocation16_spill] sm:$0xff] }
 0x12d   : > { %5338 = vmatpush3.xpose.msk.msra.mxu1 %vm379_vm0, %v1080_v26  ;;  %5345 = vmatprep.mubr.msk.f32.mxu1 %vm5654_vm1, %v7336_v6  ;;  %v7384_v26 = vld [vmem:[#allocation18_spill] sm:$0xff] }
 0x12e   : > { %5313 = vmatmul.mubr.msk.f32.vlgmr.msra.gmra.mxu0 %vm379_vm0, %v583_v40  ;;  %5339 = vmatprep.subr.mxu1 %v7336_v6  ;;  %v7383_v40 = vld [vmem:[#allocation21_spill] sm:$0xff] }
 0x12f   : > { %5327 = vmatpush3.xpose.msk.msra.mxu0 %vm379_vm0, %v1076_v48  ;;  %5334 = vmatprep.mubr.msk.f32.mxu0 %vm5654_vm1, %v7336_v6 }
 0x130   : > { %5328 = vmatprep.subr.mxu0 %v7336_v6 }
 0x131   : > { %5340 = vmatpush3.xpose.msk.msra.mxu1 %vm379_vm0, %v1079_v34  ;;  %v7385_v34 = vld [vmem:[#allocation22_spill] sm:$0xff] }
 0x132   : > { %5341 = vmatprep.subr.mxu1 %v7336_v6 }
 0x133   : > { %5329 = vmatpush3.xpose.msk.msra.mxu0 %vm379_vm0, %v6010_v61 }
 0x134   : > { %5330 = vmatprep.subr.mxu0 %v7336_v6 }
 0x135   : > { %5342 = vmatpush3.xpose.msk.msra.mxu1 %vm379_vm0, %v5996_v56  ;;  %v6505_v56 = vld [vmem:[%s7322_s4] ss:$0 sm:$0xff] }
 0x136   : > { %5343 = vmatprep.subr.mxu1 %v7336_v6  ;;  %v603_v61 = vadd.f32 %v6505_v56, %v602_v53 }
 0x137   : > { %5331 = vmatpush3.xpose.msk.msra.mxu0 %vm379_vm0, %v6019_v0  ;;  %v5135_v0 = vpop.f32.mrf.mxu0 }
 0x138   : > { %5332 = vmatprep.subr.mxu0 %v7336_v6 }
 0x139   : > { %5344 = vmatpush3.xpose.msk.msra.mxu1 %vm379_vm0, %v6000_v57  ;;  %v608_v57 = vadd.f32 %v6505_v56, %v5132_v11 }
 0x13a   : > { %5359 = vmatprep.subr.mxu1 %v7336_v6 }
 0x13b   : > { %5333 = vmatpush3.xpose.msk.msra.mxu0 %vm379_vm0, %v6023_v1  ;;  %v612_v1 = vpop.f32.mrf.mxu0 }
 0x13c   : > { %5346 = vmatmul.mubr.msk.f32.vlgmr.msra.gmra.mxu1 %vm379_vm0, %v598_v46  ;;  %5348 = vmatprep.subr.mxu0 %v7336_v6  ;;  %v7387_v46 = vld [vmem:[#allocation23_spill] sm:$0xff] }
 0x13d   : > { %5360 = vmatpush3.xpose.msk.msra.mxu1 %vm379_vm0, %v6030_v4  ;;  %5367 = vmatprep.mubr.msk.f32.mxu1 %vm5654_vm1, %v7336_v6  ;;  %v618_v4 = vadd.f32 %v6505_v56, %v5135_v0 }
 0x13e   : > { %5335 = vmatmul.mubr.msk.f32.vlgmr.msra.gmra.mxu0 %vm379_vm0, %v593_v50  ;;  %5361 = vmatprep.subr.mxu1 %v7336_v6  ;;  %v7388_v50 = vld [vmem:[#allocation20_spill] sm:$0xff] }
 0x13f   : > { %5349 = vmatpush3.xpose.msk.msra.mxu0 %vm379_vm0, %v6048_v15  ;;  %5356 = vmatprep.mubr.msk.f32.mxu0 %vm5654_vm1, %v7336_v6 }
 0x140   : > { %5350 = vmatprep.subr.mxu0 %v7336_v6 }
 0x141   : > { %5362 = vmatpush3.xpose.msk.msra.mxu1 %vm379_vm0, %v6033_v5  ;;  %v613_v5 = vadd.f32 %v6505_v56, %v612_v1 }
 0x142   : > { %5363 = vmatprep.subr.mxu1 %v7336_v6 }
 0x143   : > { %5351 = vmatpush3.xpose.msk.msra.mxu0 %vm379_vm0, %v6051_v16 }
 0x144   : > { %5352 = vmatprep.subr.mxu0 %v7336_v6 }
 0x145   : > { %5364 = vmatpush3.xpose.msk.msra.mxu1 %vm379_vm0, %v6039_v8  ;;  %v5138_v8 = vpop.f32.mrf.mxu0 }
 0x146   : > { %5365 = vmatprep.subr.mxu1 %v7336_v6  ;;  %v628_v15 = vadd.f32 %v6505_v56, %v5138_v8  ;;  %v7390_v8 = vld [vmem:[#allocation25_spill] sm:$0xff] }
 0x147   : > { %5353 = vmatpush3.xpose.msk.msra.mxu0 %vm379_vm0, %v6058_v20 }
 0x148   : > { %5354 = vmatprep.subr.mxu0 %v7336_v6 }
 0x149   : > { %5366 = vmatpush3.xpose.msk.msra.mxu1 %vm379_vm0, %v6042_v9  ;;  %v622_v9 = vpop.f32.mrf.mxu0 }
 0x14a   : > { %5381 = vmatprep.subr.mxu1 %v7336_v6  ;;  %v623_v16 = vadd.f32 %v6505_v56, %v622_v9 }
 0x14b   : > { %5355 = vmatpush3.xpose.msk.msra.mxu0 %vm379_vm0, %v6061_v21  ;;  %v5141_v20 = vpop.f32.mrf.mxu0 }
 0x14c   : > { %5368 = vmatmul.mubr.msk.f32.vlgmr.msra.gmra.mxu1 %vm379_vm0, %v608_v57  ;;  %5370 = vmatprep.subr.mxu0 %v7336_v6  ;;  %v7389_v57 = vld [vmem:[#allocation24_spill] sm:$0xff] }
 0x14d   : > { %5382 = vmatpush3.xpose.msk.msra.mxu1 %vm379_vm0, %v6066_v25  ;;  %5389 = vmatprep.mubr.msk.f32.mxu1 %vm5654_vm1, %v7336_v6  ;;  %v632_v21 = vpop.f32.mrf.mxu0  ;;  %v638_v25 = vadd.f32 %v6505_v56, %v5141_v20  ;;  %v7391_v20 = vld [vmem:[#allocation29_spill] sm:$0xff] }
 0x14e   : > { %5357 = vmatmul.mubr.msk.f32.vlgmr.msra.gmra.mxu0 %vm379_vm0, %v603_v61  ;;  %5383 = vmatprep.subr.mxu1 %v7336_v6  ;;  %v3916_v61 = vpop.permute.xlu1 %3915 }
 0x14f   : > { %5371 = vmatpush3.xpose.msk.msra.mxu0 %vm379_vm0, %v6086_v38  ;;  %5378 = vmatprep.mubr.msk.f32.mxu0 %vm5654_vm1, %v7336_v6  ;;  %v7369_v38 = vld [vmem:[#allocation4_spill] sm:$0xff] }
 0x150   : > { %5372 = vmatprep.subr.mxu0 %v7336_v6 }
 0x151   : > { %5384 = vmatpush3.xpose.msk.msra.mxu1 %vm379_vm0, %v6069_v27  ;;  %v7367_v27 = vld [vmem:[#allocation2_spill] sm:$0xff] }
 0x152   : > { %5385 = vmatprep.subr.mxu1 %v7336_v6 }
 0x153   : > { %5373 = vmatpush3.xpose.msk.msra.mxu0 %vm379_vm0, %v6089_v39  ;;  %v7370_v39 = vld [vmem:[#allocation8_spill] sm:$0xff] }
 0x154   : > { %5374 = vmatprep.subr.mxu0 %v7336_v6 }
 0x155   : > { %5386 = vmatpush3.xpose.msk.msra.mxu1 %vm379_vm0, %v6072_v28  ;;  %v633_v28 = vadd.f32 %v6505_v56, %v632_v21 }
 0x156   : > { %5387 = vmatprep.subr.mxu1 %v7336_v6 }
 0x157   : > { %5375 = vmatpush3.xpose.msk.msra.mxu0 %vm379_vm0, %v6096_v42  ;;  %v5144_v42 = vpop.f32.mrf.mxu0 }
 0x158   : > { %5376 = vmatprep.subr.mxu0 %v7336_v6 }
 0x159   : > { %5388 = vmatpush3.xpose.msk.msra.mxu1 %vm379_vm0, %v6080_v35  ;;  %v7368_v35 = vld [vmem:[#allocation3_spill] sm:$0xff] }
 0x15a   : > { %5403 = vmatprep.subr.mxu1 %v7336_v6 }
 0x15b   : > { %5377 = vmatpush3.xpose.msk.msra.mxu0 %vm379_vm0, %v6099_v43  ;;  %v7371_v43 = vld [vmem:[#allocation5_spill] sm:$0xff] }
 0x15c   : > { %5390 = vmatmul.mubr.msk.f32.vlgmr.msra.gmra.mxu1 %vm379_vm0, %v618_v4  ;;  %5392 = vmatprep.subr.mxu0 %v7336_v6  ;;  %v3914_v4 = vpop.permute.xlu0 %3913 }
 0x15d   : > { %5404 = vmatpush3.xpose.msk.msra.mxu1 %vm379_vm0, %v6104_v45  ;;  %5411 = vmatprep.mubr.msk.f32.mxu1 %vm5654_vm1, %v7336_v6  ;;  %v7372_v45 = vld [vmem:[#allocation9_spill] sm:$0xff] }
 0x15e   : > { %5379 = vmatmul.mubr.msk.f32.vlgmr.msra.gmra.mxu0 %vm379_vm0, %v613_v5  ;;  %5405 = vmatprep.subr.mxu1 %v7336_v6 }
 0x15f   : > { %5393 = vmatpush3.xpose.msk.msra.mxu0 %vm379_vm0, %v6123_v58  ;;  %5400 = vmatprep.mubr.msk.f32.mxu0 %vm5654_vm1, %v7336_v6  ;;  %v648_v58 = vadd.f32 %v6505_v56, %v5144_v42  ;;  %v7396_v42 = vld [vmem:[#allocation28_spill] sm:$0xff] }
 0x160   : > { %5394 = vmatprep.subr.mxu0 %v7336_v6 }
 0x161   : > { %5406 = vmatpush3.xpose.msk.msra.mxu1 %vm379_vm0, %v6107_v47  ;;  %v642_v47 = vpop.f32.mrf.mxu0 }
 0x162   : > { %5407 = vmatprep.subr.mxu1 %v7336_v6 }
 0x163   : > { %5395 = vmatpush3.xpose.msk.msra.mxu0 %vm379_vm0, %v6126_v59  ;;  %v7374_v59 = vld [vmem:[#allocation7_spill] sm:$0xff] }
 0x164   : > { %5396 = vmatprep.subr.mxu0 %v7336_v6 }
 0x165   : > { %5408 = vmatpush3.xpose.msk.msra.mxu1 %vm379_vm0, %v6110_v49  ;;  %v7373_v49 = vld [vmem:[#allocation6_spill] sm:$0xff] }
 0x166   : > { %5409 = vmatprep.subr.mxu1 %v7336_v6 }
 0x167   : > { %5397 = vmatpush3.xpose.msk.msra.mxu0 %vm379_vm0, %v6133_v63  ;;  %v643_v63 = vadd.f32 %v6505_v56, %v642_v47  ;;  %v3920_v47 = vpop.permute.xlu0 %3919 }
 0x168   : > { %5398 = vmatprep.subr.mxu0 %v7336_v6 }
 0x169   : > { %5410 = vmatpush3.xpose.msk.msra.mxu1 %vm379_vm0, %v6117_v54  ;;  %v5147_v54 = vpop.f32.mrf.mxu0 }
 0x16a   : > { %5425 = vmatprep.subr.mxu1 %v7336_v6  ;;  %v658_v10 = vadd.f32 %v6505_v56, %v5147_v54 }
 0x16b   : > { %5399 = vmatpush3.xpose.msk.msra.mxu0 %vm379_vm0, %v6136_v3  ;;  %v652_v3 = vpop.f32.mrf.mxu0 }
 0x16c   : > { %5412 = vmatmul.mubr.msk.f32.vlgmr.msra.gmra.mxu1 %vm379_vm0, %v628_v15  ;;  %5414 = vmatprep.subr.mxu0 %v7336_v6  ;;  %v653_v37 = vadd.f32 %v6505_v56, %v652_v3 }
 0x16d   : > { %5426 = vmatpush3.xpose.msk.msra.mxu1 %vm379_vm0, %v6142_v7  ;;  %5433 = vmatprep.mubr.msk.f32.mxu1 %vm5654_vm1, %v7336_v6  ;;  %v7375_v7 = vld [vmem:[#allocation10_spill] sm:$0xff] }
 0x16e   : > { %5401 = vmatmul.mubr.msk.f32.vlgmr.msra.gmra.mxu0 %vm379_vm0, %v623_v16  ;;  %5427 = vmatprep.subr.mxu1 %v7336_v6 }
 0x16f   : > { %5415 = vmatpush3.xpose.msk.msra.mxu0 %vm379_vm0, %v6162_v31  ;;  %5422 = vmatprep.mubr.msk.f32.mxu0 %vm5654_vm1, %v7336_v6  ;;  %v7377_v31 = vld [vmem:[#allocation11_spill] sm:$0xff] }
 0x170   : > { %5416 = vmatprep.subr.mxu0 %v7336_v6 }
 0x171   : > { %5428 = vmatpush3.xpose.msk.msra.mxu1 %vm379_vm0, %v6145_v12  ;;  %v5150_v12 = vpop.f32.mrf.mxu0 }
 0x172   : > { %5429 = vmatprep.subr.mxu1 %v7336_v6  ;;  %v668_v11 = vadd.f32 %v6505_v56, %v5150_v12 }
 0x173   : > { %5417 = vmatpush3.xpose.msk.msra.mxu0 %vm379_vm0, %v6165_v33  ;;  %v662_v33 = vpop.f32.mrf.mxu0 }
 0x174   : > { %5418 = vmatprep.subr.mxu0 %v7336_v6  ;;  %v663_v0 = vadd.f32 %v6505_v56, %v662_v33 }
 0x175   : > { %5430 = vmatpush3.xpose.msk.msra.mxu1 %vm379_vm0, %v6153_v18  ;;  %v7376_v18 = vld [vmem:[#allocation14_spill] sm:$0xff] }
 0x176   : > { %5431 = vmatprep.subr.mxu1 %v7336_v6 }
 0x177   : > { %5419 = vmatpush3.xpose.msk.msra.mxu0 %vm379_vm0, %v6172_v22  ;;  %v7378_v22 = vld [vmem:[#allocation15_spill] sm:$0xff] }
 0x178   : > { %5420 = vmatprep.subr.mxu0 %v7336_v6 }
 0x179   : > { %5432 = vmatpush3.xpose.msk.msra.mxu1 %vm379_vm0, %v7367_v27  ;;  %v7392_v27 = vld [vmem:[#allocation26_spill] sm:$0xff] }
 0x17a   : > { %5447 = vmatprep.subr.mxu1 %v7336_v6 }
 0x17b   : > { %5421 = vmatpush3.xpose.msk.msra.mxu0 %vm379_vm0, %v7368_v35  ;;  %v7393_v35 = vld [vmem:[#allocation30_spill] sm:$0xff] }
 0x17c   : > { %5434 = vmatmul.mubr.msk.f32.vlgmr.msra.gmra.mxu1 %vm379_vm0, %v638_v25  ;;  %5436 = vmatprep.subr.mxu0 %v7336_v6 }
 0x17d   : > { %5448 = vmatpush3.xpose.msk.msra.mxu1 %vm379_vm0, %v7369_v38  ;;  %5455 = vmatprep.mubr.msk.f32.mxu1 %vm5654_vm1, %v7336_v6  ;;  %v7394_v38 = vld [vmem:[#allocation27_spill] sm:$0xff] }
 0x17e   : > { %5423 = vmatmul.mubr.msk.f32.vlgmr.msra.gmra.mxu0 %vm379_vm0, %v633_v28  ;;  %5449 = vmatprep.subr.mxu1 %v7336_v6 }
 0x17f   : > { %5437 = vmatpush3.xpose.msk.msra.mxu0 %vm379_vm0, %v7370_v39  ;;  %5444 = vmatprep.mubr.msk.f32.mxu0 %vm5654_vm1, %v7336_v6  ;;  %v7395_v39 = vld [vmem:[#allocation31_spill] sm:$0xff] }
 0x180   : > { %5438 = vmatprep.subr.mxu0 %v7336_v6 }
 0x181   : > { %5450 = vmatpush3.xpose.msk.msra.mxu1 %vm379_vm0, %v7371_v43 }
 0x182   : > { %5451 = vmatprep.subr.mxu1 %v7336_v6 }
 0x183   : > { %5439 = vmatpush3.xpose.msk.msra.mxu0 %vm379_vm0, %v7372_v45  ;;  %v7397_v45 = vld [vmem:[#allocation32_spill] sm:$0xff] }
 0x184   : > { %5440 = vmatprep.subr.mxu0 %v7336_v6 }
 0x185   : > { %5452 = vmatpush3.xpose.msk.msra.mxu1 %vm379_vm0, %v7373_v49 }
 0x186   : > { %5453 = vmatprep.subr.mxu1 %v7336_v6 }
 0x187   : > { %5441 = vmatpush3.xpose.msk.msra.mxu0 %vm379_vm0, %v6210_v60  ;;  %v7379_v60 = vld [vmem:[#allocation12_spill] sm:$0xff] }
 0x188   : > { %5442 = vmatprep.subr.mxu0 %v7336_v6 }
 0x189   : > { %5454 = vmatpush3.xpose.msk.msra.mxu1 %vm379_vm0, %v7374_v59 }
 0x18a   : > { %5469 = vmatprep.subr.mxu1 %v7336_v6 }
 0x18b   : > { %5443 = vmatpush3.xpose.msk.msra.mxu0 %vm379_vm0, %v6213_v41  ;;  %v6665_v41 = vpop.f32.mrf.mxu0 }
 0x18c   : > { %5456 = vmatmul.mubr.msk.f32.vlgmr.msra.gmra.mxu1 %vm379_vm0, %v648_v58  ;;  %5458 = vmatprep.subr.mxu0 %v7336_v6  ;;  %v678_v43 = vadd.f32 %v6505_v56, %v6665_v41  ;;  %v3918_v58 = vpop.permute.xlu1 %3917  ;;  %v7401_v41 = vld [vmem:[#allocation38_spill] sm:$0xff] }
 0x18d   : > { %5470 = vmatpush3.xpose.msk.msra.mxu1 %vm379_vm0, %v7375_v7  ;;  %5477 = vmatprep.mubr.msk.f32.mxu1 %vm5654_vm1, %v7336_v6  ;;  %v672_v2 = vpop.f32.mrf.mxu0 }
 0x18e   : > { %5445 = vmatmul.mubr.msk.f32.vlgmr.msra.gmra.mxu0 %vm379_vm0, %v643_v63  ;;  %5471 = vmatprep.subr.mxu1 %v7336_v6  ;;  %v673_v49 = vadd.f32 %v6505_v56, %v672_v2  ;;  %v7398_v63 = vld [vmem:[#allocation33_spill] sm:$0xff]  ;;  %v3924_v2 = vpop.permute.xlu0 %3923 }
 0x18f   : > { %5459 = vmatpush3.xpose.msk.msra.mxu0 %vm379_vm0, %v7376_v18  ;;  %5466 = vmatprep.mubr.msk.f32.mxu0 %vm5654_vm1, %v7336_v6  ;;  %v6685_v44 = vpop.f32.mrf.mxu0  ;;  %v7399_v18 = vld [vmem:[#allocation37_spill] sm:$0xff] }
 0x190   : > { %5460 = vmatprep.subr.mxu0 %v7336_v6 }
 0x191   : > { %5472 = vmatpush3.xpose.msk.msra.mxu1 %vm379_vm0, %v7377_v31  ;;  %v6695_v48 = vpop.f32.mrf.mxu0 }
 0x192   : > { %5473 = vmatprep.subr.mxu1 %v7336_v6 }
 0x193   : > { %5461 = vmatpush3.xpose.msk.msra.mxu0 %vm379_vm0, %v7378_v22  ;;  %v6703_v19 = vpop.f32.mrf.mxu0  ;;  %v7400_v22 = vld [vmem:[#allocation34_spill] sm:$0xff] }
 0x194   : > { %5462 = vmatprep.subr.mxu0 %v7336_v6 }
 0x195   : > { %5474 = vmatpush3.xpose.msk.msra.mxu1 %vm379_vm0, %v7379_v60  ;;  %v6711_v53 = vpop.f32.mrf.mxu0 }
 0x196   : > { %5475 = vmatprep.subr.mxu1 %v7336_v6 }
 0x197   : > { %5463 = vmatpush3.xpose.msk.msra.mxu0 %vm379_vm0, %v6248_v32  ;;  %v7382_v32 = vld [vmem:[#allocation17_spill] sm:$0xff] }
 0x198   : > { %5464 = vmatprep.subr.mxu0 %v7336_v6 }
 0x199   : > { %5476 = vmatpush3.xpose.msk.msra.mxu1 %vm379_vm0, %v7380_v51  ;;  %v7403_v51 = vld [vmem:[#allocation36_spill] sm:$0xff] }
 0x19a   : > { %5491 = vmatprep.subr.mxu1 %v7336_v6 }
 0x19b   : > { %5465 = vmatpush3.xpose.msk.msra.mxu0 %vm379_vm0, %v7381_v14  ;;  %v683_v14 = vadd.f32 %v6505_v56, %v6695_v48 }
 0x19c   : > { %5478 = vmatmul.mubr.msk.f32.vlgmr.msra.gmra.mxu1 %vm379_vm0, %v658_v10  ;;  %5480 = vmatprep.subr.mxu0 %v7336_v6  ;;  %v7402_v10 = vld [vmem:[#allocation35_spill] sm:$0xff] }
 0x19d   : > { %5492 = vmatpush3.xpose.msk.msra.mxu1 %vm379_vm0, %v7382_v32  ;;  %5499 = vmatprep.mubr.msk.f32.mxu1 %vm5654_vm1, %v7336_v6 }
 0x19e   : > { %5467 = vmatmul.mubr.msk.f32.vlgmr.msra.gmra.mxu0 %vm379_vm0, %v653_v37  ;;  %5493 = vmatprep.subr.mxu1 %v7336_v6  ;;  %v688_v37 = vadd.f32 %v6505_v56, %v6685_v44 }
 0x19f   : > { %5481 = vmatpush3.xpose.msk.msra.mxu0 %vm379_vm0, %v7383_v40  ;;  %5488 = vmatprep.mubr.msk.f32.mxu0 %vm5654_vm1, %v7336_v6 }
 0x1a0   : > { %5482 = vmatprep.subr.mxu0 %v7336_v6 }
 0x1a1   : > { %5494 = vmatpush3.xpose.msk.msra.mxu1 %vm379_vm0, %v7384_v26 }
 0x1a2   : > { %5495 = vmatprep.subr.mxu1 %v7336_v6 }
 0x1a3   : > { %5483 = vmatpush3.xpose.msk.msra.mxu0 %vm379_vm0, %v7385_v34 }
 0x1a4   : > { %5484 = vmatprep.subr.mxu0 %v7336_v6 }
 0x1a5   : > { %5496 = vmatpush3.xpose.msk.msra.mxu1 %vm379_vm0, %v7386_v13 }
 0x1a6   : > { %5497 = vmatprep.subr.mxu1 %v7336_v6 }
 0x1a7   : > { %5485 = vmatpush3.xpose.msk.msra.mxu0 %vm379_vm0, %v7387_v46 }
 0x1a8   : > { %5486 = vmatprep.subr.mxu0 %v7336_v6  ;;  %v1327_v1 = vpop.f32.mrf.mxu1 }
 0x1a9   : > { %5498 = vmatpush3.xpose.msk.msra.mxu1 %vm379_vm0, %v7388_v50  ;;  %v6719_v5 = vmul.f32 %v3916_v61, %v1327_v1 }
 0x1aa   : > { %5513 = vmatprep.subr.mxu1 %v7336_v6  ;;  %v1242_v9 = vpop.f32.mrf.mxu0  ;;  %v5237_v15 = vpop.f32.mrf.mxu1 }
 0x1ab   : > { %5487 = vmatpush3.xpose.msk.msra.mxu0 %vm379_vm0, %v7389_v57  ;;  %v6727_v16 = vmul.f32 %v3914_v4, %v1242_v9  ;;  %v4044_v21 = vsel %vm379_vm0, %v6719_v5, 0.0 }
 0x1ac   : > { %5500 = vmatmul.mubr.msk.f32.vlgmr.msra.gmra.mxu1 %vm379_vm0, %v668_v11  ;;  %5502 = vmatprep.subr.mxu0 %v7336_v6  ;;  %v5226_v25 = vpop.f32.mrf.mxu0 }
 0x1ad   : > { %5514 = vmatpush3.xpose.msk.msra.mxu1 %vm379_vm0, %v7390_v8  ;;  %5521 = vmatprep.mubr.msk.f32.mxu1 %vm5654_vm1, %v7336_v6  ;;  %v4041_v28 = vsel %vm379_vm0, %v6727_v16, 0.0 }
 0x1ae   : > { %5489 = vmatmul.mubr.msk.f32.vlgmr.msra.gmra.mxu0 %vm379_vm0, %v663_v0  ;;  %5515 = vmatprep.subr.mxu1 %v7336_v6 }
 0x1af   : > { %5503 = vmatpush3.xpose.msk.msra.mxu0 %vm379_vm0, %v7391_v20  ;;  %5510 = vmatprep.mubr.msk.f32.mxu0 %vm5654_vm1, %v7336_v6 }
 0x1b0   : > { %4045 = vadd.xlane.f32.xlu0 %v4044_v21  ;;  %5504 = vmatprep.subr.mxu0 %v7336_v6 }
 0x1b1   : > { %5516 = vmatpush3.xpose.msk.msra.mxu1 %vm379_vm0, %v7392_v27  ;;  %4042 = vadd.xlane.f32.xlu1 %v4041_v28 }
 0x1b2   : > { %5517 = vmatprep.subr.mxu1 %v7336_v6 }
 0x1b3   : > { %5505 = vmatpush3.xpose.msk.msra.mxu0 %vm379_vm0, %v7393_v35 }
 0x1b4   : > { %5506 = vmatprep.subr.mxu0 %v7336_v6 }
 0x1b5   : > { %5518 = vmatpush3.xpose.msk.msra.mxu1 %vm379_vm0, %v7394_v38 }
 0x1b6   : > { %5519 = vmatprep.subr.mxu1 %v7336_v6 }
 0x1b7   : > { %5507 = vmatpush3.xpose.msk.msra.mxu0 %vm379_vm0, %v7395_v39 }
 0x1b8   : > { %5508 = vmatprep.subr.mxu0 %v7336_v6  ;;  %v1497_v54 = vpop.f32.mrf.mxu1 }
 0x1b9   : > { %5520 = vmatpush3.xpose.msk.msra.mxu1 %vm379_vm0, %v7396_v42  ;;  %v6760_v59 = vmul.f32 %v3920_v47, %v1497_v54 }
 0x1ba   : > { %5535 = vmatprep.subr.mxu1 %v7336_v6  ;;  %v1412_v3 = vpop.f32.mrf.mxu0  ;;  %v5259_v7 = vpop.f32.mrf.mxu1 }
 0x1bb   : > { %5509 = vmatpush3.xpose.msk.msra.mxu0 %vm379_vm0, %v7397_v45  ;;  %v6768_v12 = vmul.f32 %v3918_v58, %v1412_v3  ;;  %v4050_v31 = vsel %vm379_vm0, %v6760_v59, 0.0 }
 0x1bc   : > { %5522 = vmatmul.mubr.msk.f32.vlgmr.msra.gmra.mxu1 %vm379_vm0, %v678_v43  ;;  %5524 = vmatprep.subr.mxu0 %v7336_v6  ;;  %v5248_v33 = vpop.f32.mrf.mxu0 }
 0x1bd   : > { %5536 = vmatpush3.xpose.msk.msra.mxu1 %vm379_vm0, %v7398_v63  ;;  %5543 = vmatprep.mubr.msk.f32.mxu1 %vm5654_vm1, %v7336_v6  ;;  %v4047_v60 = vsel %vm379_vm0, %v6768_v12, 0.0 }
 0x1be   : > { %5511 = vmatmul.mubr.msk.f32.vlgmr.msra.gmra.mxu0 %vm379_vm0, %v673_v49  ;;  %5537 = vmatprep.subr.mxu1 %v7336_v6 }
 0x1bf   : > { %5525 = vmatpush3.xpose.msk.msra.mxu0 %vm379_vm0, %v7399_v18  ;;  %5532 = vmatprep.mubr.msk.f32.mxu0 %vm5654_vm1, %v7336_v6 }
 0x1c0   : > { %4051 = vadd.xlane.f32.xlu1 %v4050_v31  ;;  %5526 = vmatprep.subr.mxu0 %v7336_v6 }
 0x1c1   : > { %5538 = vmatpush3.xpose.msk.msra.mxu1 %vm379_vm0, %v7400_v22  ;;  %4048 = vadd.xlane.f32.xlu0 %v4047_v60 }
 0x1c2   : > { %5539 = vmatprep.subr.mxu1 %v7336_v6 }
 0x1c3   : > { %5527 = vmatpush3.xpose.msk.msra.mxu0 %vm379_vm0, %v7401_v41 }
 0x1c4   : > { %5528 = vmatprep.subr.mxu0 %v7336_v6 }
 0x1c5   : > { %5540 = vmatpush3.xpose.msk.msra.mxu1 %vm379_vm0, %v7402_v10 }
 0x1c6   : > { %5541 = vmatprep.subr.mxu1 %v7336_v6 }
 0x1c7   : > { %5529 = vmatpush3.xpose.msk.msra.mxu0 %vm379_vm0, %v6362_v17  ;;  %v3922_v17 = vpop.permute.xlu1 %3921 }
 0x1c8   : > { %5530 = vmatprep.subr.mxu0 %v7336_v6 }
 0x1c9   : > { %5542 = vmatpush3.xpose.msk.msra.mxu1 %vm379_vm0, %v7403_v51  ;;  %v1667_v32 = vpop.f32.mrf.mxu1 }
 0x1ca   : > { %5557 = vmatprep.subr.mxu1 %v7336_v6  ;;  %v6802_v40 = vmul.f32 %v3924_v2, %v1667_v32 }
 0x1cb   : > { %5531 = vmatpush3.xpose.msk.msra.mxu0 %vm379_vm0, %v6365_v24  ;;  %v5281_v24 = vpop.f32.mrf.mxu1  ;;  %v3926_v46 = vpop.permute.xlu1 %3925 }
 0x1cc   : > { %5544 = vmatmul.mubr.msk.f32.vlgmr.msra.gmra.mxu1 %vm379_vm0, %v688_v37  ;;  %5546 = vmatprep.subr.mxu0 %v7336_v6  ;;  %v1582_v44 = vpop.f32.mrf.mxu0  ;;  %v4056_v48 = vsel %vm379_vm0, %v6802_v40, 0.0 }
 0x1cd   : > { %5558 = vmatpush3.xpose.msk.msra.mxu1 %vm379_vm0, %v6370_v52  ;;  %5565 = vmatprep.mubr.msk.f32.mxu1 %vm5654_vm1, %v7336_v6  ;;  %v6810_v26 = vmul.f32 %v3922_v17, %v1582_v44 }
 0x1ce   : > { %5533 = vmatmul.mubr.msk.f32.vlgmr.msra.gmra.mxu0 %vm379_vm0, %v683_v14  ;;  %5559 = vmatprep.subr.mxu1 %v7336_v6  ;;  %v5270_v52 = vpop.f32.mrf.mxu0 }
 0x1cf   : > { %5547 = vmatpush3.xpose.msk.msra.mxu0 %vm379_vm0, %v6388_v30  ;;  %5554 = vmatprep.mubr.msk.f32.mxu0 %vm5654_vm1, %v7336_v6  ;;  %v4053_v34 = vsel %vm379_vm0, %v6810_v26, 0.0  ;;  %v698_v30 = vadd.f32 %v6505_v56, %v6703_v19  ;;  %v3930_v61 = vpop.permute.xlu1 %3929 }
 0x1d0   : > { %4057 = vadd.xlane.f32.xlu1 %v4056_v48  ;;  %5548 = vmatprep.subr.mxu0 %v7336_v6 }
 0x1d1   : > { %5560 = vmatpush3.xpose.msk.msra.mxu1 %vm379_vm0, %v6373_v23  ;;  %4054 = vadd.xlane.f32.xlu0 %v4053_v34  ;;  %v7404_v23 = vld [vmem:[#allocation39_spill] sm:$0xff] }
 0x1d2   : > { %5561 = vmatprep.subr.mxu1 %v7336_v6 }
 0x1d3   : > { %5549 = vmatpush3.xpose.msk.msra.mxu0 %vm379_vm0, %v6391_v55  ;;  %v3928_v55 = vpop.permute.xlu0 %3927  ;;  %v3934_v27 = vpop.permute.xlu1 %3933 }
 0x1d4   : > { %5550 = vmatprep.subr.mxu0 %v7336_v6 }
 0x1d5   : > { %5562 = vmatpush3.xpose.msk.msra.mxu1 %vm379_vm0, %v6376_v62  ;;  %v693_v62 = vadd.f32 %v6505_v56, %v6711_v53 }
 0x1d6   : > { %5563 = vmatprep.subr.mxu1 %v7336_v6 }
 0x1d7   : > { %5551 = vmatpush3.xpose.msk.msra.mxu0 %vm379_vm0, %v6397_v36  ;;  %v3932_v53 = vpop.permute.xlu0 %3931  ;;  %v3938_v54 = vpop.permute.xlu1 %3937 }
 0x1d8   : > { %5552 = vmatprep.subr.mxu0 %v7336_v6 }
 0x1d9   : > { %5564 = vmatpush3.xpose.msk.msra.mxu1 %vm379_vm0, %v7404_v23 }
 0x1db   : > { %5553 = vmatpush3.xpose.msk.msra.mxu0 %vm379_vm0, %v6400_v29  ;;  %v3936_v21 = vpop.permute.xlu0 %3935  ;;  %v3942_v41 = vpop.permute.xlu1 %3941 }
 0x1dc   : > { %v1837_v13 = vpop.f32.mrf.mxu1  ;;  %5566 = vmatmul.mubr.msk.f32.vlgmr.msra.gmra.mxu1 %vm379_vm0, %v698_v30 }
 0x1dd   : > { %v6842_v36 = vmul.f32 %v3928_v55, %v1837_v13 }
 0x1de   : > { %v1752_v6 = vpop.f32.mrf.mxu0  ;;  %5555 = vmatmul.mubr.msk.f32.vlgmr.msra.gmra.mxu0 %vm379_vm0, %v693_v62  ;;  %v5303_v50 = vpop.f32.mrf.mxu1 }
 0x1df   : > { %v6845_v11 = vmul.f32 %v3926_v46, %v1752_v6  ;;  %v4062_v19 = vsel %vm379_vm0, %v6842_v36, 0.0  ;;  %v3940_v47 = vpop.permute.xlu0 %3939  ;;  %v3946_v48 = vpop.permute.xlu1 %3945 }
 0x1e0   : > { %4063 = vadd.xlane.f32.xlu1 %v4062_v19  ;;  %v5292_v29 = vpop.f32.mrf.mxu0 }
 0x1e1   : > { %v4059_v56 = vsel %vm379_vm0, %v6845_v11, 0.0 }
 0x1e2   : > { %4060 = vadd.xlane.f32.xlu0 %v4059_v56 }
 0x1e3   : > { %v3944_v22 = vpop.permute.xlu0 %3943  ;;  %v3950_v50 = vpop.permute.xlu1 %3949 }
 0x1e7   : > { %v3948_v44 = vpop.permute.xlu0 %3947 }
 0x1eb   : > { %v3952_v46 = vpop.permute.xlu0 %3951 }
 0x1ec   : > { %v2007_v57 = vpop.f32.mrf.mxu1 }
 0x1ed   : > { %v6851_v0 = vmul.f32 %v3932_v53, %v2007_v57 }
 0x1ee   : > { %v1922_v1 = vpop.f32.mrf.mxu0  ;;  %v5325_v4 = vpop.f32.mrf.mxu1 }
 0x1ef   : > { %v6853_v8 = vmul.f32 %v3930_v61, %v1922_v1  ;;  %v4068_v9 = vsel %vm379_vm0, %v6851_v0, 0.0  ;;  %v3956_v4 = vpop.permute.xlu0 %3955 }
 0x1f0   : > { %4069 = vadd.xlane.f32.xlu1 %v4068_v9  ;;  %v5314_v15 = vpop.f32.mrf.mxu0 }
 0x1f1   : > { %v4065_v20 = vsel %vm379_vm0, %v6853_v8, 0.0  ;;  %v3954_v15 = vpop.permute.xlu1 %3953 }
 0x1f2   : > { %4066 = vadd.xlane.f32.xlu0 %v4065_v20 }
 0x1fc   : > { %v2177_v25 = vpop.f32.mrf.mxu1 }
 0x1fd   : > { %v6859_v28 = vmul.f32 %v3936_v21, %v2177_v25 }
 0x1fe   : > { %v2092_v35 = vpop.f32.mrf.mxu0  ;;  %v5347_v38 = vpop.f32.mrf.mxu1 }
 0x1ff   : > { %v6861_v39 = vmul.f32 %v3934_v27, %v2092_v35  ;;  %v4074_v42 = vsel %vm379_vm0, %v6859_v28, 0.0 }
 0x200   : > { %4075 = vadd.xlane.f32.xlu1 %v4074_v42  ;;  %v5336_v43 = vpop.f32.mrf.mxu0 }
 0x201   : > { %v4071_v45 = vsel %vm379_vm0, %v6861_v39, 0.0  ;;  %v3960_v43 = vpop.permute.xlu0 %3959 }
 0x202   : > { %4072 = vadd.xlane.f32.xlu0 %v4071_v45 }
 0x20c   : > { %v2347_v49 = vpop.f32.mrf.mxu1 }
 0x20d   : > { %v6867_v58 = vmul.f32 %v3940_v47, %v2347_v49  ;;  %v3958_v47 = vpop.permute.xlu1 %3957 }
 0x20e   : > { %v2262_v63 = vpop.f32.mrf.mxu0  ;;  %v5369_v3 = vpop.f32.mrf.mxu1 }
 0x20f   : > { %v6869_v7 = vmul.f32 %v3938_v54, %v2262_v63  ;;  %v4080_v18 = vsel %vm379_vm0, %v6867_v58, 0.0 }
 0x210   : > { %4081 = vadd.xlane.f32.xlu1 %v4080_v18  ;;  %v5358_v31 = vpop.f32.mrf.mxu0 }
 0x211   : > { %v4077_v33 = vsel %vm379_vm0, %v6869_v7, 0.0 }
 0x212   : > { %4078 = vadd.xlane.f32.xlu0 %v4077_v33 }
 0x21c   : > { %v2517_v60 = vpop.f32.mrf.mxu1 }
 0x21d   : > { %v6875_v10 = vmul.f32 %v3944_v22, %v2517_v60  ;;  %v3964_v22 = vpop.permute.xlu0 %3963 }
 0x21e   : > { %v2432_v51 = vpop.f32.mrf.mxu0  ;;  %v5391_v37 = vpop.f32.mrf.mxu1 }
 0x21f   : > { %v6877_v2 = vmul.f32 %v3942_v41, %v2432_v51  ;;  %v4086_v14 = vsel %vm379_vm0, %v6875_v10, 0.0  ;;  %v3962_v41 = vpop.permute.xlu1 %3961 }
 0x220   : > { %4087 = vadd.xlane.f32.xlu1 %v4086_v14  ;;  %v5380_v32 = vpop.f32.mrf.mxu0 }
 0x221   : > { %v4083_v17 = vsel %vm379_vm0, %v6877_v2, 0.0 }
 0x222   : > { %4084 = vadd.xlane.f32.xlu0 %v4083_v17 }
 0x22c   : > { %v2687_v24 = vpop.f32.mrf.mxu1 }
 0x22d   : > { %v6883_v52 = vmul.f32 %v3948_v44, %v2687_v24 }
 0x22e   : > { %v2602_v34 = vpop.f32.mrf.mxu0  ;;  %v5413_v23 = vpop.f32.mrf.mxu1 }
 0x22f   : > { %v6885_v30 = vmul.f32 %v3946_v48, %v2602_v34  ;;  %v4092_v55 = vsel %vm379_vm0, %v6883_v52, 0.0  ;;  %v3968_v48 = vpop.permute.xlu0 %3967  ;;  %v3966_v23 = vpop.permute.xlu1 %3965 }
 0x230   : > { %4093 = vadd.xlane.f32.xlu1 %v4092_v55  ;;  %v5402_v62 = vpop.f32.mrf.mxu0 }
 0x231   : > { %v4089_v13 = vsel %vm379_vm0, %v6885_v30, 0.0 }
 0x232   : > { %4090 = vadd.xlane.f32.xlu0 %v4089_v13 }
 0x23c   : > { %v2857_v6 = vpop.f32.mrf.mxu1 }
 0x23d   : > { %v6891_v19 = vmul.f32 %v3952_v46, %v2857_v6 }
 0x23e   : > { %v2772_v29 = vpop.f32.mrf.mxu0  ;;  %v5435_v56 = vpop.f32.mrf.mxu1 }
 0x23f   : > { %v6893_v53 = vmul.f32 %v3950_v50, %v2772_v29  ;;  %v4098_v57 = vsel %vm379_vm0, %v6891_v19, 0.0  ;;  %v3972_v56 = vpop.permute.xlu0 %3971 }
 0x240   : > { %4099 = vadd.xlane.f32.xlu1 %v4098_v57  ;;  %v5424_v61 = vpop.f32.mrf.mxu0  ;;  %v3970_v57 = vpop.permute.xlu1 %3969 }
 0x241   : > { %v4095_v1 = vsel %vm379_vm0, %v6893_v53, 0.0 }
 0x242   : > { %4096 = vadd.xlane.f32.xlu0 %v4095_v1 }
 0x24c   : > { %v3027_v9 = vpop.f32.mrf.mxu1 }
 0x24d   : > { %v6899_v20 = vmul.f32 %v3956_v4, %v3027_v9 }
 0x24e   : > { %v2942_v21 = vpop.f32.mrf.mxu0  ;;  %v5457_v25 = vpop.f32.mrf.mxu1 }
 0x24f   : > { %v6901_v27 = vmul.f32 %v3954_v15, %v2942_v21  ;;  %v4104_v35 = vsel %vm379_vm0, %v6899_v20, 0.0  ;;  %v3976_v15 = vpop.permute.xlu0 %3975 }
 0x250   : > { %4105 = vadd.xlane.f32.xlu1 %v4104_v35  ;;  %v5446_v38 = vpop.f32.mrf.mxu0  ;;  %v3974_v35 = vpop.permute.xlu1 %3973 }
 0x251   : > { %v4101_v42 = vsel %vm379_vm0, %v6901_v27, 0.0 }
 0x252   : > { %4102 = vadd.xlane.f32.xlu0 %v4101_v42 }
 0x25c   : > { %v3197_v45 = vpop.f32.mrf.mxu1 }
 0x25d   : > { %v6907_v49 = vmul.f32 %v3960_v43, %v3197_v45  ;;  %v4046_v43 = vpop.xlane.xlu0 %4045  ;;  %v4043_v45 = vpop.xlane.xlu1 %4042 }
 0x25e   : > { %v3112_v54 = vpop.f32.mrf.mxu0  ;;  %v5479_v63 = vpop.f32.mrf.mxu1 }
 0x25f   : > { %v6909_v3 = vmul.f32 %v3958_v47, %v3112_v54  ;;  %v4110_v18 = vsel %vm379_vm0, %v6907_v49, 0.0  ;;  %v4139_v47 = vmul.f32 0.03125, %v4046_v43  ;;  %v4138_v63 = vmul.f32 0.03125, %v4043_v45 }
 0x260   : > { %4111 = vadd.xlane.f32.xlu1 %v4110_v18  ;;  %v5468_v31 = vpop.f32.mrf.mxu0 }
 0x261   : > { %v4107_v33 = vsel %vm379_vm0, %v6909_v3, 0.0  ;;  %v4052_v54 = vpop.xlane.xlu1 %4051  ;;  %v4049_v18 = vpop.xlane.xlu0 %4048  ;;  %v6940_v31 = vsub.f32 %v6719_v5, %v4139_v47 }
 0x262   : > { %4108 = vadd.xlane.f32.xlu0 %v4107_v33  ;;  %v4141_v33 = vmul.f32 0.03125, %v4052_v54 }
 0x26c   : > { %v3367_v60 = vpop.f32.mrf.mxu1 }
 0x26d   : > { %v6915_v51 = vmul.f32 %v3964_v22, %v3367_v60  ;;  %v4058_v22 = vpop.xlane.xlu1 %4057 }
 0x26e   : > { %v3282_v37 = vpop.f32.mrf.mxu0  ;;  %v5501_v14 = vpop.f32.mrf.mxu1  ;;  %v4143_v5 = vmul.f32 0.03125, %v4058_v22 }
 0x26f   : > { %v6917_v32 = vmul.f32 %v3962_v41, %v3282_v37  ;;  %v4116_v17 = vsel %vm379_vm0, %v6915_v51, 0.0  ;;  %v6943_v41 = vsub.f32 %v6727_v16, %v4138_v63  ;;  %v4140_v37 = vmul.f32 0.03125, %v4049_v18  ;;  %v4055_v14 = vpop.xlane.xlu0 %4054 }
 0x270   : > { %4117 = vadd.xlane.f32.xlu1 %v4116_v17  ;;  %v5490_v44 = vpop.f32.mrf.mxu0 }
 0x271   : > { %v4113_v24 = vsel %vm379_vm0, %v6917_v32, 0.0  ;;  %v4064_v16 = vpop.xlane.xlu1 %4063 }
 0x272   : > { %4114 = vadd.xlane.f32.xlu0 %v4113_v24 }
 0x27c   : > { %v3537_v34 = vpop.f32.mrf.mxu1 }
 0x27d   : > { %v6923_v55 = vmul.f32 %v3968_v48, %v3537_v34  ;;  %v4203_v48 = vmul.f32 %v6940_v31, %v6940_v31  ;;  %v6950_v34 = vsub.f32 %v6760_v59, %v4141_v33  ;;  %v4202_v59 = vmul.f32 %v6943_v41, %v6943_v41 }
 0x27e   : > { %v3452_v62 = vpop.f32.mrf.mxu0  ;;  %v5523_v13 = vpop.f32.mrf.mxu1 }
 0x27f   : > { %v6925_v46 = vmul.f32 %v3966_v23, %v3452_v62  ;;  %v4122_v6 = vsel %vm379_vm0, %v6923_v55, 0.0 }
 0x280   : > { %4123 = vadd.xlane.f32.xlu1 %v4122_v6  ;;  %v5512_v50 = vpop.f32.mrf.mxu0  ;;  %v6957_v6 = vsub.f32 %v6768_v12, %v4140_v37  ;;  %v4070_v12 = vpop.xlane.xlu1 %4069 }
 0x281   : > { %v4119_v29 = vsel %vm379_vm0, %v6925_v46, 0.0  ;;  %v4142_v50 = vmul.f32 0.03125, %v4055_v14  ;;  %v4147_v43 = vmul.f32 0.03125, %v4070_v12 }
 0x282   : > { %4120 = vadd.xlane.f32.xlu0 %v4119_v29 }
 0x289   : > { %v4076_v54 = vpop.xlane.xlu1 %4075 }
 0x28c   : > { %v3707_v61 = vpop.f32.mrf.mxu1 }
 0x28d   : > { %v6931_v1 = vmul.f32 %v3972_v56, %v3707_v61  ;;  %v4061_v56 = vpop.xlane.xlu0 %4060  ;;  %v4145_v61 = vmul.f32 0.03125, %v4064_v16 }
 0x28e   : > { %v3622_v4 = vpop.f32.mrf.mxu0  ;;  %v5545_v9 = vpop.f32.mrf.mxu1 }
 0x28f   : > { %v6933_v21 = vmul.f32 %v3970_v57, %v3622_v4  ;;  %v4128_v25 = vsel %vm379_vm0, %v6931_v1, 0.0  ;;  %v6964_v57 = vsub.f32 %v6802_v40, %v4143_v5  ;;  %v4237_v4 = vsel %vm379_vm0, %v4203_v48, 0.0 }
 0x290   : > { %4129 = vadd.xlane.f32.xlu1 %v4128_v25  ;;  %v5534_v38 = vpop.f32.mrf.mxu0  ;;  %v4205_v9 = vmul.f32 %v6950_v34, %v6950_v34  ;;  %v4144_v25 = vmul.f32 0.03125, %v4061_v56  ;;  %v6976_v40 = vsub.f32 %v6842_v36, %v4145_v61  ;;  %v6988_v36 = vsub.f32 %v6851_v0, %v4147_v43 }
 0x291   : > { %v4125_v42 = vsel %vm379_vm0, %v6933_v21, 0.0  ;;  %v4204_v38 = vmul.f32 %v6957_v6, %v6957_v6  ;;  %v4207_v47 = vmul.f32 %v6964_v57, %v6964_v57 }
 0x292   : > { %4126 = vadd.xlane.f32.xlu0 %v4125_v42  ;;  %v4067_v42 = vpop.xlane.xlu0 %4066  ;;  %v4243_v45 = vsel %vm379_vm0, %v4205_v9, 0.0  ;;  %v4209_v14 = vmul.f32 %v6976_v40, %v6976_v40 }
 0x293   : > { %v4146_v63 = vmul.f32 0.03125, %v4067_v42  ;;  %v4240_v18 = vsel %vm379_vm0, %v4204_v38, 0.0  ;;  %v4249_v37 = vsel %vm379_vm0, %v4207_v47, 0.0 }
 0x296   : > { %v4073_v22 = vpop.xlane.xlu0 %4072 }
 0x29c   : > { %v3877_v60 = vpop.f32.mrf.mxu1 }
 0x29d   : > { %v6945_v17 = vmul.f32 %v3976_v15, %v3877_v60  ;;  %v6970_v15 = vsub.f32 %v6810_v26, %v4142_v50  ;;  %v6982_v26 = vsub.f32 %v6845_v11, %v4144_v25  ;;  %v4149_v60 = vmul.f32 0.03125, %v4076_v54 }
 0x29e   : > { %v3792_v44 = vpop.f32.mrf.mxu0  ;;  %v5567_v24 = vpop.f32.mrf.mxu1  ;;  %v6994_v11 = vsub.f32 %v6853_v8, %v4146_v63  ;;  %v4211_v50 = vmul.f32 %v6988_v36, %v6988_v36 }
 0x29f   : > { %v6952_v23 = vmul.f32 %v3974_v35, %v3792_v44  ;;  %v4134_v62 = vsel %vm379_vm0, %v6945_v17, 0.0  ;;  %v4234_v35 = vsel %vm379_vm0, %v4202_v59, 0.0  ;;  %v4206_v33 = vmul.f32 %v6970_v15, %v6970_v15  ;;  %v4082_v44 = vpop.xlane.xlu1 %4081 }
 0x2a0   : > { %4135 = vadd.xlane.f32.xlu1 %v4134_v62  ;;  %v5556_v13 = vpop.f32.mrf.mxu0  ;;  %v4148_v24 = vmul.f32 0.03125, %v4073_v22  ;;  %v4208_v5 = vmul.f32 %v6982_v26, %v6982_v26  ;;  %v4079_v62 = vpop.xlane.xlu0 %4078  ;;  %v7000_v0 = vsub.f32 %v6859_v28, %v4149_v60  ;;  %v4151_v16 = vmul.f32 0.03125, %v4082_v44 }
 0x2a1   : > { %v4131_v29 = vsel %vm379_vm0, %v6952_v23, 0.0  ;;  %v4246_v48 = vsel %vm379_vm0, %v4206_v33, 0.0  ;;  %v4255_v13 = vsel %vm379_vm0, %v4209_v14, 0.0  ;;  %v4150_v59 = vmul.f32 0.03125, %v4079_v62 }
 0x2a2   : > { %4132 = vadd.xlane.f32.xlu0 %v4131_v29  ;;  %v7006_v8 = vsub.f32 %v6861_v39, %v4148_v24  ;;  %v4252_v56 = vsel %vm379_vm0, %v4208_v5, 0.0  ;;  %v4210_v61 = vmul.f32 %v6994_v11, %v6994_v11  ;;  %v7012_v28 = vsub.f32 %v6867_v58, %v4151_v16 }
 0x2a3   : > { %v4261_v12 = vsel %vm379_vm0, %v4211_v50, 0.0  ;;  %v4213_v25 = vmul.f32 %v7000_v0, %v7000_v0  ;;  %v7018_v39 = vsub.f32 %v6869_v7, %v4150_v59 }
 0x2a4   : > { %4238 = vadd.xlane.f32.xlu1 %v4237_v4  ;;  %v4258_v38 = vsel %vm379_vm0, %v4210_v61, 0.0  ;;  %v4212_v42 = vmul.f32 %v7006_v8, %v7006_v8 }
 0x2a5   : > { %v4267_v43 = vsel %vm379_vm0, %v4213_v25, 0.0  ;;  %v4214_v63 = vmul.f32 %v7018_v39, %v7018_v39 }
 0x2a6   : > { %4235 = vadd.xlane.f32.xlu0 %v4234_v35  ;;  %v4264_v54 = vsel %vm379_vm0, %v4212_v42, 0.0 }
 0x2a8   : > { %4244 = vadd.xlane.f32.xlu1 %v4243_v45  ;;  %v4215_v45 = vmul.f32 %v7012_v28, %v7012_v28 }
 0x2a9   : > { %v4088_v29 = vpop.xlane.xlu1 %4087 }
 0x2aa   : > { %4241 = vadd.xlane.f32.xlu0 %v4240_v18  ;;  %v4153_v9 = vmul.f32 0.03125, %v4088_v29 }
 0x2ab   : > { %v4085_v4 = vpop.xlane.xlu0 %4084 }
 0x2ac   : > { %4250 = vadd.xlane.f32.xlu1 %v4249_v37  ;;  %v4152_v35 = vmul.f32 0.03125, %v4085_v4  ;;  %v7024_v58 = vsub.f32 %v6875_v10, %v4153_v9  ;;  %v4273_v10 = vsel %vm379_vm0, %v4215_v45, 0.0 }
 0x2ae   : > { %4247 = vadd.xlane.f32.xlu0 %v4246_v48  ;;  %v7030_v47 = vsub.f32 %v6877_v2, %v4152_v35  ;;  %v4217_v22 = vmul.f32 %v7024_v58, %v7024_v58  ;;  %v4270_v2 = vsel %vm379_vm0, %v4214_v63, 0.0 }
 0x2b0   : > { %4256 = vadd.xlane.f32.xlu1 %v4255_v13  ;;  %v4216_v14 = vmul.f32 %v7030_v47, %v7030_v47  ;;  %v4279_v24 = vsel %vm379_vm0, %v4217_v22, 0.0 }
 0x2b2   : > { %4253 = vadd.xlane.f32.xlu0 %v4252_v56 }
 0x2b4   : > { %4262 = vadd.xlane.f32.xlu1 %v4261_v12 }
 0x2b6   : > { %4259 = vadd.xlane.f32.xlu0 %v4258_v38 }
 0x2b8   : > { %4268 = vadd.xlane.f32.xlu1 %v4267_v43 }
 0x2b9   : > { %v4094_v7 = vpop.xlane.xlu1 %4093 }
 0x2ba   : > { %v4155_v18 = vmul.f32 0.03125, %v4094_v7  ;;  %4265 = vadd.xlane.f32.xlu0 %v4264_v54 }
 0x2bb   : > { %v4091_v33 = vpop.xlane.xlu0 %4090 }
 0x2bc   : > { %v7039_v60 = vsub.f32 %v6883_v52, %v4155_v18  ;;  %v4154_v37 = vmul.f32 0.03125, %v4091_v33  ;;  %4274 = vadd.xlane.f32.xlu1 %v4273_v10  ;;  %v4276_v52 = vsel %vm379_vm0, %v4216_v14, 0.0 }
 0x2be   : > { %v7045_v44 = vsub.f32 %v6885_v30, %v4154_v37  ;;  %4271 = vadd.xlane.f32.xlu0 %v4270_v2  ;;  %v4219_v48 = vmul.f32 %v7039_v60, %v7039_v60 }
 0x2c0   : > { %4280 = vadd.xlane.f32.xlu1 %v4279_v24  ;;  %v4218_v5 = vmul.f32 %v7045_v44, %v7045_v44  ;;  %v4285_v62 = vsel %vm379_vm0, %v4219_v48, 0.0 }
 0x2c2   : > { %4277 = vadd.xlane.f32.xlu0 %v4276_v52  ;;  %v4282_v16 = vsel %vm379_vm0, %v4218_v5, 0.0 }
 0x2c4   : > { %4286 = vadd.xlane.f32.xlu1 %v4285_v62 }
 0x2c6   : > { %4283 = vadd.xlane.f32.xlu0 %v4282_v16 }
 0x2c9   : > { %v4100_v30 = vpop.xlane.xlu1 %4099 }
 0x2ca   : > { %v4157_v13 = vmul.f32 0.03125, %v4100_v30 }
 0x2cb   : > { %v4097_v50 = vpop.xlane.xlu0 %4096 }
 0x2cc   : > { %v7056_v29 = vsub.f32 %v6891_v19, %v4157_v13  ;;  %v4156_v59 = vmul.f32 0.03125, %v4097_v50 }
 0x2ce   : > { %v7059_v56 = vsub.f32 %v6893_v53, %v4156_v59  ;;  %v4221_v61 = vmul.f32 %v7056_v29, %v7056_v29 }
 0x2d0   : > { %v4291_v4 = vsel %vm379_vm0, %v4221_v61, 0.0  ;;  %v4220_v9 = vmul.f32 %v7059_v56, %v7059_v56 }
 0x2d1   : > { %4292 = vadd.xlane.f32.xlu1 %v4291_v4 }
 0x2d2   : > { %v4288_v12 = vsel %vm379_vm0, %v4220_v9, 0.0 }
 0x2d3   : > { %4289 = vadd.xlane.f32.xlu0 %v4288_v12 }
 0x2d9   : > { %v4106_v25 = vpop.xlane.xlu1 %4105 }
 0x2da   : > { %v4159_v35 = vmul.f32 0.03125, %v4106_v25 }
 0x2db   : > { %v4103_v19 = vpop.xlane.xlu0 %4102 }
 0x2dc   : > { %v7068_v38 = vsub.f32 %v6899_v20, %v4159_v35  ;;  %v4158_v53 = vmul.f32 0.03125, %v4103_v19 }
 0x2de   : > { %v7071_v42 = vsub.f32 %v6901_v27, %v4158_v53  ;;  %v4223_v43 = vmul.f32 %v7068_v38, %v7068_v38 }
 0x2e0   : > { %v4297_v45 = vsel %vm379_vm0, %v4223_v43, 0.0  ;;  %v4222_v7 = vmul.f32 %v7071_v42, %v7071_v42 }
 0x2e1   : > { %4298 = vadd.xlane.f32.xlu1 %v4297_v45 }
 0x2e2   : > { %v4294_v54 = vsel %vm379_vm0, %v4222_v7, 0.0 }
 0x2e3   : > { %4295 = vadd.xlane.f32.xlu0 %v4294_v54 }
 0x2e9   : > { %v4112_v63 = vpop.xlane.xlu1 %4111 }
 0x2ea   : > { %v4161_v18 = vmul.f32 0.03125, %v4112_v63 }
 0x2eb   : > { %v4109_v20 = vpop.xlane.xlu0 %4108 }
 0x2ec   : > { %v7080_v33 = vsub.f32 %v6907_v49, %v4161_v18  ;;  %v4160_v27 = vmul.f32 0.03125, %v4109_v20 }
 0x2ee   : > { %v7083_v10 = vsub.f32 %v6909_v3, %v4160_v27  ;;  %v4225_v22 = vmul.f32 %v7080_v33, %v7080_v33 }
 0x2f0   : > { %v4303_v37 = vsel %vm379_vm0, %v4225_v22, 0.0  ;;  %v4224_v2 = vmul.f32 %v7083_v10, %v7083_v10 }
 0x2f1   : > { %4304 = vadd.xlane.f32.xlu1 %v4303_v37 }
 0x2f2   : > { %v4300_v14 = vsel %vm379_vm0, %v4224_v2, 0.0 }
 0x2f3   : > { %4301 = vadd.xlane.f32.xlu0 %v4300_v14 }
 0x2f9   : > { %v4118_v24 = vpop.xlane.xlu1 %4117 }
 0x2fa   : > { %v4163_v48 = vmul.f32 0.03125, %v4118_v24 }
 0x2fb   : > { %v4115_v49 = vpop.xlane.xlu0 %4114 }
 0x2fc   : > { %v7092_v52 = vsub.f32 %v6915_v51, %v4163_v48  ;;  %v4162_v3 = vmul.f32 0.03125, %v4115_v49 }
 0x2fe   : > { %v7095_v5 = vsub.f32 %v6917_v32, %v4162_v3  ;;  %v4227_v62 = vmul.f32 %v7092_v52, %v7092_v52 }
 0x300   : > { %v4309_v16 = vsel %vm379_vm0, %v4227_v62, 0.0  ;;  %v4226_v30 = vmul.f32 %v7095_v5, %v7095_v5 }
 0x301   : > { %4310 = vadd.xlane.f32.xlu1 %v4309_v16 }
 0x302   : > { %v4306_v13 = vsel %vm379_vm0, %v4226_v30, 0.0 }
 0x303   : > { %4307 = vadd.xlane.f32.xlu0 %v4306_v13 }
 0x309   : > { %v4124_v50 = vpop.xlane.xlu1 %4123 }
 0x30a   : > { %v4165_v59 = vmul.f32 0.03125, %v4124_v50 }
 0x30b   : > { %v4121_v51 = vpop.xlane.xlu0 %4120 }
 0x30c   : > { %v7104_v61 = vsub.f32 %v6923_v55, %v4165_v59  ;;  %v4164_v32 = vmul.f32 0.03125, %v4121_v51 }
 0x30e   : > { %v7107_v4 = vsub.f32 %v6925_v46, %v4164_v32  ;;  %v4229_v9 = vmul.f32 %v7104_v61, %v7104_v61 }
 0x310   : > { %v4315_v12 = vsel %vm379_vm0, %v4229_v9, 0.0  ;;  %v4228_v25 = vmul.f32 %v7107_v4, %v7107_v4 }
 0x311   : > { %4316 = vadd.xlane.f32.xlu1 %v4315_v12 }
 0x312   : > { %v4312_v35 = vsel %vm379_vm0, %v4228_v25, 0.0 }
 0x313   : > { %4313 = vadd.xlane.f32.xlu0 %v4312_v35 }
 0x319   : > { %v4130_v19 = vpop.xlane.xlu1 %4129 }
 0x31a   : > { %v4167_v53 = vmul.f32 0.03125, %v4130_v19 }
 0x31b   : > { %v4127_v55 = vpop.xlane.xlu0 %4126 }
 0x31c   : > { %v7116_v43 = vsub.f32 %v6931_v1, %v4167_v53  ;;  %v4166_v46 = vmul.f32 0.03125, %v4127_v55 }
 0x31e   : > { %v7119_v45 = vsub.f32 %v6933_v21, %v4166_v46  ;;  %v4231_v7 = vmul.f32 %v7116_v43, %v7116_v43 }
 0x320   : > { %v4321_v54 = vsel %vm379_vm0, %v4231_v7, 0.0  ;;  %v4230_v63 = vmul.f32 %v7119_v45, %v7119_v45 }
 0x321   : > { %4322 = vadd.xlane.f32.xlu1 %v4321_v54 }
 0x322   : > { %v4318_v18 = vsel %vm379_vm0, %v4230_v63, 0.0 }
 0x323   : > { %4319 = vadd.xlane.f32.xlu0 %v4318_v18 }
 0x329   : > { %v4136_v20 = vpop.xlane.xlu1 %4135 }
 0x32a   : > { %v4169_v27 = vmul.f32 0.03125, %v4136_v20 }
 0x32b   : > { %v4133_v1 = vpop.xlane.xlu0 %4132 }
 0x32c   : > { %v7128_v22 = vsub.f32 %v6945_v17, %v4169_v27  ;;  %v4168_v21 = vmul.f32 0.03125, %v4133_v1 }
 0x32d   : > { %v4239_v37 = vpop.xlane.xlu1 %4238 }
 0x32e   : > { %v7131_v2 = vsub.f32 %v6952_v23, %v4168_v21  ;;  %v4331_v14 = vmul.f32 0.03125, %v4239_v37  ;;  %v4233_v24 = vmul.f32 %v7128_v22, %v7128_v22  ;;  %v7142_v21 = vld [vmem:[%s7323_s5] ss:$0 sm:$0xff] }
 0x32f   : > { %v4236_v48 = vpop.xlane.xlu0 %4235 }
 0x330   : > { %v4363_v49 = vadd.f32 1e-05, %v4331_v14  ;;  %v4330_v3 = vmul.f32 0.03125, %v4236_v48  ;;  %v4327_v62 = vsel %vm379_vm0, %v4233_v24, 0.0  ;;  %v4232_v16 = vmul.f32 %v7131_v2, %v7131_v2 }
 0x331   : > { %4328 = vadd.xlane.f32.xlu1 %v4327_v62  ;;  %v4245_v17 = vpop.xlane.xlu1 %4244 }
 0x332   : > { %5579 = vrsqrt.f32 %v4363_v49  ;;  %v4362_v30 = vadd.f32 1e-05, %v4330_v3  ;;  %v4333_v13 = vmul.f32 0.03125, %v4245_v17  ;;  %v4324_v23 = vsel %vm379_vm0, %v4232_v16, 0.0  ;;  %v7148_v3 = vld [vmem:[%s7323_s5 + $0x1] ss:$0 sm:$0xff] }
 0x333   : > { %4325 = vadd.xlane.f32.xlu0 %v4324_v23  ;;  %v4242_v50 = vpop.xlane.xlu0 %4241 }
 0x334   : > { %5581 = vrsqrt.f32 %v4362_v30  ;;  %v4365_v59 = vadd.f32 1e-05, %v4333_v13  ;;  %v4332_v51 = vmul.f32 0.03125, %v4242_v50 }
 0x335   : > { %v4251_v32 = vpop.xlane.xlu1 %4250 }
 0x336   : > { %5583 = vrsqrt.f32 %v4365_v59  ;;  %v4364_v9 = vadd.f32 1e-05, %v4332_v51  ;;  %v4335_v12 = vmul.f32 0.03125, %v4251_v32 }
 0x337   : > { %v4248_v25 = vpop.xlane.xlu0 %4247 }
 0x338   : > { %5585 = vrsqrt.f32 %v4364_v9  ;;  %v4367_v35 = vadd.f32 1e-05, %v4335_v12  ;;  %v4334_v19 = vmul.f32 0.03125, %v4248_v25 }
 0x339   : > { %v4257_v53 = vpop.xlane.xlu1 %4256 }
 0x33a   : > { %5587 = vrsqrt.f32 %v4367_v35  ;;  %v4366_v55 = vadd.f32 1e-05, %v4334_v19  ;;  %v4337_v46 = vmul.f32 0.03125, %v4257_v53 }
 0x33b   : > { %v4254_v7 = vpop.xlane.xlu0 %4253 }
 0x33c   : > { %5589 = vrsqrt.f32 %v4366_v55  ;;  %v4369_v54 = vadd.f32 1e-05, %v4337_v46  ;;  %v4336_v63 = vmul.f32 0.03125, %v4254_v7 }
 0x33d   : > { %v4263_v18 = vpop.xlane.xlu1 %4262 }
 0x33e   : > { %5591 = vrsqrt.f32 %v4369_v54  ;;  %v4368_v20 = vadd.f32 1e-05, %v4336_v63  ;;  %v4339_v27 = vmul.f32 0.03125, %v4263_v18 }
 0x33f   : > { %v5580_v1 = vpop.eup %5579  ;;  %v4260_v37 = vpop.xlane.xlu0 %4259 }
 0x340   : > { %v4427_v14 = vmul.f32 %v5580_v1, %v6940_v31  ;;  %5593 = vrsqrt.f32 %v4368_v20  ;;  %v4371_v24 = vadd.f32 1e-05, %v4339_v27  ;;  %v4338_v48 = vmul.f32 0.03125, %v4260_v37 }
 0x341   : > { %v5582_v49 = vpop.eup %5581  ;;  %v4269_v62 = vpop.xlane.xlu1 %4268 }
 0x342   : > { %v4464_v16 = vmul.f32 %v7142_v21, %v4427_v14  ;;  %v4426_v17 = vmul.f32 %v5582_v49, %v6943_v41  ;;  %5595 = vrsqrt.f32 %v4371_v24  ;;  %v4370_v30 = vadd.f32 1e-05, %v4338_v48 }
 0x343   : > { %v5584_v13 = vpop.eup %5583  ;;  %v4341_v31 = vmul.f32 0.03125, %v4269_v62  ;;  %v4266_v23 = vpop.xlane.xlu0 %4265 }
 0x344   : > { %v4501_v50 = vadd.f32 %v7148_v3, %v4464_v16  ;;  %v4463_v59 = vmul.f32 %v7142_v21, %v4426_v17  ;;  %v4429_v51 = vmul.f32 %v5584_v13, %v6950_v34  ;;  %5597 = vrsqrt.f32 %v4370_v30 }
 0x345   : > { %v5586_v41 = vpop.eup %5585  ;;  %v4373_v32 = vadd.f32 1e-05, %v4341_v31  ;;  %v4340_v9 = vmul.f32 0.03125, %v4266_v23  ;;  %v4275_v12 = vpop.xlane.xlu1 %4274 }
 0x346   : > { %4533 = vst.msk [vmem:[%s7156_s26 + $0x8] sm:$0xff] %vm379_vm0, %v4501_v50  ;;  %v4500_v25 = vadd.f32 %v7148_v3, %v4463_v59  ;;  %v4466_v35 = vmul.f32 %v7142_v21, %v4429_v51  ;;  %v4428_v19 = vmul.f32 %v5586_v41, %v6957_v6  ;;  %v4343_v53 = vmul.f32 0.03125, %v4275_v12 }
 0x347   : > { %v5588_v55 = vpop.eup %5587  ;;  %5599 = vrsqrt.f32 %v4373_v32  ;;  %v4372_v46 = vadd.f32 1e-05, %v4340_v9  ;;  %v4272_v7 = vpop.xlane.xlu0 %4271 }
 0x348   : > { %4532 = vst.msk [vmem:[%s7156_s26] sm:$0xff] %vm379_vm0, %v4500_v25  ;;  %v4503_v34 = vadd.f32 %v7148_v3, %v4466_v35  ;;  %v4465_v54 = vmul.f32 %v7142_v21, %v4428_v19  ;;  %v4431_v63 = vmul.f32 %v5588_v55, %v6964_v57  ;;  %v4375_v18 = vadd.f32 1e-05, %v4343_v53 }
 0x349   : > { %v5590_v20 = vpop.eup %5589  ;;  %5601 = vrsqrt.f32 %v4372_v46  ;;  %v4342_v27 = vmul.f32 0.03125, %v4272_v7  ;;  %v4281_v1 = vpop.xlane.xlu1 %4280 }
 0x34a   : > { %4535 = vst.msk [vmem:[%s7156_s26 + $0x18] sm:$0xff] %vm379_vm0, %v4503_v34  ;;  %v4502_v6 = vadd.f32 %v7148_v3, %v4465_v54  ;;  %v4468_v37 = vmul.f32 %v7142_v21, %v4431_v63  ;;  %v4430_v14 = vmul.f32 %v5590_v20, %v6970_v15  ;;  %5603 = vrsqrt.f32 %v4375_v18 }
 0x34b   : > { %v5592_v24 = vpop.eup %5591  ;;  %v4374_v48 = vadd.f32 1e-05, %v4342_v27  ;;  %v4345_v49 = vmul.f32 0.03125, %v4281_v1  ;;  %v4278_v62 = vpop.xlane.xlu0 %4277 }
 0x34c   : > { %4534 = vst.msk [vmem:[%s7156_s26 + $0x10] sm:$0xff] %vm379_vm0, %v4502_v6  ;;  %v4505_v57 = vadd.f32 %v7148_v3, %v4468_v37  ;;  %v4467_v16 = vmul.f32 %v7142_v21, %v4430_v14  ;;  %v4433_v17 = vmul.f32 %v5592_v24, %v6976_v40  ;;  %v4344_v30 = vmul.f32 0.03125, %v4278_v62 }
 0x34d   : > { %v5594_v13 = vpop.eup %5593  ;;  %5605 = vrsqrt.f32 %v4374_v48  ;;  %v4377_v31 = vadd.f32 1e-05, %v4345_v49  ;;  %v4287_v23 = vpop.xlane.xlu1 %4286 }
 0x34e   : > { %4537 = vst.msk [vmem:[%s7156_s26 + $0x28] sm:$0xff] %vm379_vm0, %v4505_v57  ;;  %v4504_v15 = vadd.f32 %v7148_v3, %v4467_v16  ;;  %v4470_v50 = vmul.f32 %v7142_v21, %v4433_v17  ;;  %v4432_v59 = vmul.f32 %v5594_v13, %v6982_v26  ;;  %v4376_v51 = vadd.f32 1e-05, %v4344_v30 }
 0x34f   : > { %v5596_v41 = vpop.eup %5595  ;;  %5607 = vrsqrt.f32 %v4377_v31  ;;  %v4347_v32 = vmul.f32 0.03125, %v4287_v23  ;;  %v4284_v9 = vpop.xlane.xlu0 %4283 }
 0x350   : > { %4536 = vst.msk [vmem:[%s7156_s26 + $0x20] sm:$0xff] %vm379_vm0, %v4504_v15  ;;  %v4507_v40 = vadd.f32 %v7148_v3, %v4470_v50  ;;  %v4469_v12 = vmul.f32 %v7142_v21, %v4432_v59  ;;  %v4435_v25 = vmul.f32 %v5596_v41, %v6988_v36  ;;  %5609 = vrsqrt.f32 %v4376_v51 }
 0x351   : > { %v5598_v35 = vpop.eup %5597  ;;  %v4379_v19 = vadd.f32 1e-05, %v4347_v32  ;;  %v4346_v53 = vmul.f32 0.03125, %v4284_v9 }
 0x352   : > { %4539 = vst.msk [vmem:[%s7156_s26 + $0x38] sm:$0xff] %vm379_vm0, %v4507_v40  ;;  %v4506_v26 = vadd.f32 %v7148_v3, %v4469_v12  ;;  %v4472_v55 = vmul.f32 %v7142_v21, %v4435_v25  ;;  %v4434_v46 = vmul.f32 %v5598_v35, %v6994_v11 }
 0x353   : > { %5611 = vrsqrt.f32 %v4379_v19  ;;  %v4378_v7 = vadd.f32 1e-05, %v4346_v53 }
 0x354   : > { %v5600_v34 = vpop.eup %5599  ;;  %4538 = vst.msk [vmem:[%s7156_s26 + $0x30] sm:$0xff] %vm379_vm0, %v4506_v26  ;;  %v4509_v36 = vadd.f32 %v7148_v3, %v4472_v55  ;;  %v4471_v54 = vmul.f32 %v7142_v21, %v4434_v46 }
 0x355   : > { %v4437_v63 = vmul.f32 %v5600_v34, %v7000_v0  ;;  %5613 = vrsqrt.f32 %v4378_v7 }
 0x356   : > { %v5602_v18 = vpop.eup %5601  ;;  %4541 = vst.msk [vmem:[%s7156_s26 + $0x48] sm:$0xff] %vm379_vm0, %v4509_v36  ;;  %v4508_v20 = vadd.f32 %v7148_v3, %v4471_v54 }
 0x357   : > { %v5604_v27 = vpop.eup %5603  ;;  %v4474_v11 = vmul.f32 %v7142_v21, %v4437_v63  ;;  %v4436_v1 = vmul.f32 %v5602_v18, %v7006_v8 }
 0x358   : > { %4540 = vst.msk [vmem:[%s7156_s26 + $0x40] sm:$0xff] %vm379_vm0, %v4508_v20  ;;  %v4439_v6 = vmul.f32 %v5604_v27, %v7012_v28 }
 0x359   : > { %v4511_v37 = vadd.f32 %v7148_v3, %v4474_v11  ;;  %v4473_v0 = vmul.f32 %v7142_v21, %v4436_v1 }
 0x35a   : > { %v5606_v14 = vpop.eup %5605  ;;  %v4476_v24 = vmul.f32 %v7142_v21, %v4439_v6  ;;  %v4293_v48 = vpop.xlane.xlu1 %4292 }
 0x35b   : > { %4543 = vst.msk [vmem:[%s7156_s26 + $0x58] sm:$0xff] %vm379_vm0, %v4511_v37  ;;  %v4510_v49 = vadd.f32 %v7148_v3, %v4473_v0  ;;  %v4438_v8 = vmul.f32 %v5606_v14, %v7018_v39  ;;  %v4349_v62 = vmul.f32 0.03125, %v4293_v48 }
 0x35c   : > { %v5608_v57 = vpop.eup %5607  ;;  %v4513_v16 = vadd.f32 %v7148_v3, %v4476_v24  ;;  %v4290_v28 = vpop.xlane.xlu0 %4289 }
 0x35d   : > { %v5610_v17 = vpop.eup %5609  ;;  %4542 = vst.msk [vmem:[%s7156_s26 + $0x50] sm:$0xff] %vm379_vm0, %v4510_v49  ;;  %v4475_v30 = vmul.f32 %v7142_v21, %v4438_v8  ;;  %v4441_v13 = vmul.f32 %v5608_v57, %v7024_v58  ;;  %v4381_v31 = vadd.f32 1e-05, %v4349_v62  ;;  %v4348_v23 = vmul.f32 0.03125, %v4290_v28 }
 0x35e   : > { %4545 = vst.msk [vmem:[%s7156_s26 + $0x68] sm:$0xff] %vm379_vm0, %v4513_v16  ;;  %v4440_v39 = vmul.f32 %v5610_v17, %v7030_v47 }
 0x35f   : > { %v4512_v15 = vadd.f32 %v7148_v3, %v4475_v30  ;;  %v4478_v50 = vmul.f32 %v7142_v21, %v4441_v13  ;;  %5615 = vrsqrt.f32 %v4381_v31  ;;  %v4380_v59 = vadd.f32 1e-05, %v4348_v23 }
 0x360   : > { %v5612_v51 = vpop.eup %5611  ;;  %v4477_v41 = vmul.f32 %v7142_v21, %v4440_v39 }
 0x361   : > { %4544 = vst.msk [vmem:[%s7156_s26 + $0x60] sm:$0xff] %vm379_vm0, %v4512_v15  ;;  %v4515_v58 = vadd.f32 %v7148_v3, %v4478_v50  ;;  %v4443_v32 = vmul.f32 %v5612_v51, %v7039_v60  ;;  %5617 = vrsqrt.f32 %v4380_v59 }
 0x362   : > { %v5614_v47 = vpop.eup %5613  ;;  %v4514_v9 = vadd.f32 %v7148_v3, %v4477_v41 }
 0x363   : > { %4547 = vst.msk [vmem:[%s7156_s26 + $0x78] sm:$0xff] %vm379_vm0, %v4515_v58  ;;  %v4480_v40 = vmul.f32 %v7142_v21, %v4443_v32  ;;  %v4442_v12 = vmul.f32 %v5614_v47, %v7045_v44 }
 0x364   : > { %4546 = vst.msk [vmem:[%s7156_s26 + $0x70] sm:$0xff] %vm379_vm0, %v4514_v9 }
 0x365   : > { %v4517_v25 = vadd.f32 %v7148_v3, %v4480_v40  ;;  %v4479_v35 = vmul.f32 %v7142_v21, %v4442_v12 }
 0x367   : > { %4549 = vst.msk [vmem:[%s7156_s26 + $0x88] sm:$0xff] %vm379_vm0, %v4517_v25  ;;  %v4516_v60 = vadd.f32 %v7148_v3, %v4479_v35 }
 0x369   : > { %4548 = vst.msk [vmem:[%s7156_s26 + $0x80] sm:$0xff] %vm379_vm0, %v4516_v60 }
 0x36a   : > { %v4299_v19 = vpop.xlane.xlu1 %4298 }
 0x36b   : > { %v4351_v53 = vmul.f32 0.03125, %v4299_v19 }
 0x36c   : > { %v5616_v26 = vpop.eup %5615  ;;  %v4296_v55 = vpop.xlane.xlu0 %4295 }
 0x36d   : > { %v4445_v44 = vmul.f32 %v5616_v26, %v7056_v29  ;;  %v4383_v46 = vadd.f32 1e-05, %v4351_v53  ;;  %v4350_v7 = vmul.f32 0.03125, %v4296_v55 }
 0x36e   : > { %v5618_v34 = vpop.eup %5617 }
 0x36f   : > { %v4482_v36 = vmul.f32 %v7142_v21, %v4445_v44  ;;  %v4444_v54 = vmul.f32 %v5618_v34, %v7059_v56  ;;  %5619 = vrsqrt.f32 %v4383_v46  ;;  %v4382_v63 = vadd.f32 1e-05, %v4350_v7 }
 0x371   : > { %v4519_v18 = vadd.f32 %v7148_v3, %v4482_v36  ;;  %v4481_v20 = vmul.f32 %v7142_v21, %v4444_v54  ;;  %5621 = vrsqrt.f32 %v4382_v63 }
 0x373   : > { %4551 = vst.msk [vmem:[%s7156_s26 + $0x98] sm:$0xff] %vm379_vm0, %v4519_v18  ;;  %v4518_v27 = vadd.f32 %v7148_v3, %v4481_v20 }
 0x375   : > { %4550 = vst.msk [vmem:[%s7156_s26 + $0x90] sm:$0xff] %vm379_vm0, %v4518_v27 }
 0x37a   : > { %v4305_v29 = vpop.xlane.xlu1 %4304 }
 0x37b   : > { %v4353_v11 = vmul.f32 0.03125, %v4305_v29 }
 0x37c   : > { %v5620_v1 = vpop.eup %5619  ;;  %v4302_v6 = vpop.xlane.xlu0 %4301 }
 0x37d   : > { %v4447_v56 = vmul.f32 %v5620_v1, %v7068_v38  ;;  %v4385_v37 = vadd.f32 1e-05, %v4353_v11  ;;  %v4352_v0 = vmul.f32 0.03125, %v4302_v6 }
 0x37e   : > { %v5622_v14 = vpop.eup %5621 }
 0x37f   : > { %v4484_v24 = vmul.f32 %v7142_v21, %v4447_v56  ;;  %v4446_v48 = vmul.f32 %v5622_v14, %v7071_v42  ;;  %5623 = vrsqrt.f32 %v4385_v37  ;;  %v4384_v49 = vadd.f32 1e-05, %v4352_v0 }
 0x381   : > { %v4521_v8 = vadd.f32 %v7148_v3, %v4484_v24  ;;  %v4483_v62 = vmul.f32 %v7142_v21, %v4446_v48  ;;  %5625 = vrsqrt.f32 %v4384_v49 }
 0x383   : > { %4553 = vst.msk [vmem:[%s7156_s26 + $0xa8] sm:$0xff] %vm379_vm0, %v4521_v8  ;;  %v4520_v57 = vadd.f32 %v7148_v3, %v4483_v62 }
 0x385   : > { %4552 = vst.msk [vmem:[%s7156_s26 + $0xa0] sm:$0xff] %vm379_vm0, %v4520_v57 }
 0x38a   : > { %v4311_v38 = vpop.xlane.xlu1 %4310 }
 0x38b   : > { %v4355_v16 = vmul.f32 0.03125, %v4311_v38 }
 0x38c   : > { %v5624_v28 = vpop.eup %5623  ;;  %v4308_v17 = vpop.xlane.xlu0 %4307 }
 0x38d   : > { %v4449_v42 = vmul.f32 %v5624_v28, %v7080_v33  ;;  %v4387_v30 = vadd.f32 1e-05, %v4355_v16  ;;  %v4354_v13 = vmul.f32 0.03125, %v4308_v17 }
 0x38e   : > { %v5626_v31 = vpop.eup %5625 }
 0x38f   : > { %v4486_v23 = vmul.f32 %v7142_v21, %v4449_v42  ;;  %v4448_v39 = vmul.f32 %v5626_v31, %v7083_v10  ;;  %5627 = vrsqrt.f32 %v4387_v30  ;;  %v4386_v15 = vadd.f32 1e-05, %v4354_v13 }
 0x391   : > { %v4523_v50 = vadd.f32 %v7148_v3, %v4486_v23  ;;  %v4485_v59 = vmul.f32 %v7142_v21, %v4448_v39  ;;  %5629 = vrsqrt.f32 %v4386_v15 }
 0x393   : > { %4555 = vst.msk [vmem:[%s7156_s26 + $0xb8] sm:$0xff] %vm379_vm0, %v4523_v50  ;;  %v4522_v51 = vadd.f32 %v7148_v3, %v4485_v59 }
 0x395   : > { %4554 = vst.msk [vmem:[%s7156_s26 + $0xb0] sm:$0xff] %vm379_vm0, %v4522_v51 }
 0x39a   : > { %v4317_v33 = vpop.xlane.xlu1 %4316 }
 0x39b   : > { %v4357_v41 = vmul.f32 0.03125, %v4317_v33 }
 0x39c   : > { %v5628_v58 = vpop.eup %5627  ;;  %v4314_v32 = vpop.xlane.xlu0 %4313 }
 0x39d   : > { %v4451_v10 = vmul.f32 %v5628_v58, %v7092_v52  ;;  %v4389_v47 = vadd.f32 1e-05, %v4357_v41  ;;  %v4356_v9 = vmul.f32 0.03125, %v4314_v32 }
 0x39e   : > { %v5630_v40 = vpop.eup %5629 }
 0x39f   : > { %v4488_v12 = vmul.f32 %v7142_v21, %v4451_v10  ;;  %v4450_v25 = vmul.f32 %v5630_v40, %v7095_v5  ;;  %5631 = vrsqrt.f32 %v4389_v47  ;;  %v4388_v35 = vadd.f32 1e-05, %v4356_v9 }
 0x3a1   : > { %v4525_v60 = vadd.f32 %v7148_v3, %v4488_v12  ;;  %v4487_v19 = vmul.f32 %v7142_v21, %v4450_v25  ;;  %5633 = vrsqrt.f32 %v4388_v35 }
 0x3a3   : > { %4557 = vst.msk [vmem:[%s7156_s26 + $0xc8] sm:$0xff] %vm379_vm0, %v4525_v60  ;;  %v4524_v53 = vadd.f32 %v7148_v3, %v4487_v19 }
 0x3a5   : > { %4556 = vst.msk [vmem:[%s7156_s26 + $0xc0] sm:$0xff] %vm379_vm0, %v4524_v53 }
 0x3aa   : > { %v4323_v52 = vpop.xlane.xlu1 %4322 }
 0x3ab   : > { %v4359_v26 = vmul.f32 0.03125, %v4323_v52 }
 0x3ac   : > { %v5632_v55 = vpop.eup %5631  ;;  %v4320_v44 = vpop.xlane.xlu0 %4319 }
 0x3ad   : > { %v4453_v5 = vmul.f32 %v5632_v55, %v7104_v61  ;;  %v4391_v46 = vadd.f32 1e-05, %v4359_v26  ;;  %v4358_v7 = vmul.f32 0.03125, %v4320_v44 }
 0x3ae   : > { %v5634_v34 = vpop.eup %5633 }
 0x3af   : > { %v4490_v36 = vmul.f32 %v7142_v21, %v4453_v5  ;;  %v4452_v54 = vmul.f32 %v5634_v34, %v7107_v4  ;;  %5635 = vrsqrt.f32 %v4391_v46  ;;  %v4390_v63 = vadd.f32 1e-05, %v4358_v7 }
 0x3b1   : > { %v4527_v18 = vadd.f32 %v7148_v3, %v4490_v36  ;;  %v4489_v20 = vmul.f32 %v7142_v21, %v4452_v54  ;;  %5637 = vrsqrt.f32 %v4390_v63 }
 0x3b3   : > { %4559 = vst.msk [vmem:[%s7156_s26 + $0xd8] sm:$0xff] %vm379_vm0, %v4527_v18  ;;  %v4526_v27 = vadd.f32 %v7148_v3, %v4489_v20 }
 0x3b5   : > { %4558 = vst.msk [vmem:[%s7156_s26 + $0xd0] sm:$0xff] %vm379_vm0, %v4526_v27 }
 0x3ba   : > { %v4329_v61 = vpop.xlane.xlu1 %4328 }
 0x3bb   : > { %v4361_v29 = vmul.f32 0.03125, %v4329_v61 }
 0x3bc   : > { %v5636_v11 = vpop.eup %5635  ;;  %v4326_v1 = vpop.xlane.xlu0 %4325 }
 0x3bd   : > { %v4455_v4 = vmul.f32 %v5636_v11, %v7116_v43  ;;  %v4393_v6 = vadd.f32 1e-05, %v4361_v29  ;;  %v4360_v56 = vmul.f32 0.03125, %v4326_v1 }
 0x3be   : > { %v5638_v37 = vpop.eup %5637 }
 0x3bf   : > { %v4492_v0 = vmul.f32 %v7142_v21, %v4455_v4  ;;  %v4454_v14 = vmul.f32 %v5638_v37, %v7119_v45  ;;  %5639 = vrsqrt.f32 %v4393_v6  ;;  %v4392_v24 = vadd.f32 1e-05, %v4360_v56 }
 0x3c1   : > { %v4529_v48 = vadd.f32 %v7148_v3, %v4492_v0  ;;  %v4491_v49 = vmul.f32 %v7142_v21, %v4454_v14  ;;  %5641 = vrsqrt.f32 %v4392_v24 }
 0x3c3   : > { %4561 = vst.msk [vmem:[%s7156_s26 + $0xe8] sm:$0xff] %vm379_vm0, %v4529_v48  ;;  %v4528_v43 = vadd.f32 %v7148_v3, %v4491_v49 }
 0x3c5   : > { %4560 = vst.msk [vmem:[%s7156_s26 + $0xe0] sm:$0xff] %vm379_vm0, %v4528_v43 }
 0x3cc   : > { %v5640_v8 = vpop.eup %5639 }
 0x3cd   : > { %v4457_v62 = vmul.f32 %v5640_v8, %v7128_v22 }
 0x3ce   : > { %v5642_v57 = vpop.eup %5641 }
 0x3cf   : > { %v4494_v45 = vmul.f32 %v7142_v21, %v4457_v62  ;;  %v4456_v38 = vmul.f32 %v5642_v57, %v7131_v2 }
 0x3d1   : > { %v4531_v16 = vadd.f32 %v7148_v3, %v4494_v45  ;;  %v4493_v28 = vmul.f32 %v7142_v21, %v4456_v38 }
 0x3d3   : > { %4563 = vst.msk [vmem:[%s7156_s26 + $0xf8] sm:$0xff] %vm379_vm0, %v4531_v16  ;;  %v4530_v17 = vadd.f32 %v7148_v3, %v4493_v28 }
 0x3d5   : > { %4562 = vst.msk [vmem:[%s7156_s26 + $0xf0] sm:$0xff] %vm379_vm0, %v4530_v17 }
 0x3d6 PF: > { %s17_s24 = sadd.s32 1, %s5650_s24  }
 0x3d7   : > { %p14_p4 = scmp.ge.s32.totalorder %s17_s24, 4  }
 0x3d9   :  { %16 = sbr.rel (!%p14_p4) target bundleno = 1 (0x1), region = 81 }

</bundles_post_ra>
